<compile_context>
chip_gen: v6e
topology: v6e:2x2x1
jax: 0.10.0
libtpu: 0.0.40
codegen_flags: <defaults>
</compile_context>

<pallas_src>
import functools

import jax
import jax.numpy as jnp
from jax.experimental import pallas as pl
from jax.experimental.pallas import tpu as pltpu

# ----------------------------- configuration --------------------------------
N_HEAD = 2
D_HEAD = 64           # HD = 128 -> lane-dense head slab / o_net operand
D_MODEL = 128         # lane-dense activations and output stores
D_INNER = 256         # accepted by the torch ctor, unused in this forward
CONV_SIZE = 7
QLEN = 8
BSZ = 2
SCALE = 1.0 / (D_HEAD ** 0.5)   # 2**-3: folding into q is exact in bf16
LN_EPS = 1e-5
MXU_DTYPE = jnp.bfloat16        # MXU operand dtype (f32 accumulation)


# ------------------------------ kernel helpers -------------------------------
def _shift_rows(slab, d):
    """out[l, :] = slab[l + d, :] if 0 <= l + d < L else 0.

    Pure sublane data movement (static slice + concat with zeros); equivalent
    to pltpu.roll(slab, -d, axis=0) with the wrapped rows zeroed.  Never
    touches the MXU (replaces the one-hot shift-matrix matmuls)."""
    if d == 0:
        return slab
    zeros = jnp.zeros((abs(d), slab.shape[1]), slab.dtype)
    if d > 0:
        return jnp.concatenate([slab[d:, :], zeros], axis=0)
    return jnp.concatenate([zeros, slab[:d, :]], axis=0)


# --------------------------- fused Pallas kernel ------------------------------
def _decoder_layer_kernel(x_ref, wqkv_ref, r_ref, wr_ref, taps_ref, cbias_ref,
                          qbias_ref, wo_ref, ln_ref, *rest,
                          n_head, d_head, conv_k, scale, eps, mask_mode):
    """One batch element per grid step: qkv/r projections, motif convs,
    relative-position attention with per-head (Q, R) scores, o_net, residual
    + LayerNorm.  Dropout / dropatt are identity (eval mode)."""
    if mask_mode == "tensor":
        mask_ref, o_ref = rest
    else:
        (o_ref,) = rest

    f32 = jnp.float32
    mxu = wqkv_ref.dtype
    Q = x_ref.shape[1]
    R = r_ref.shape[0]
    HD = n_head * d_head
    pad = conv_k // 2
    dn_t = (((1,), (1,)), ((), ()))          # contract last dims: A @ B^T

    x = x_ref[0]                                               # (Q, Dm) f32

    # --- qkv_net / r_net projections (bf16 operands, f32 accumulation) -------
    w_heads = jnp.dot(x.astype(mxu), wqkv_ref[...],
                      preferred_element_type=f32)              # (Q, 3HD)
    r_head_k = jnp.dot(r_ref[...].astype(mxu), wr_ref[...],
                       preferred_element_type=f32)             # (R, HD)

    # --- motif_net_{q,k,v}: Conv1d(d_head, d_head, K) along the sequence -----
    # The K window offsets are materialised once per slab (shared across
    # heads); each head then does ONE (Q, K*D) x (K*D, D) MXU matmul against
    # the taps concatenated over K (compact taps, no block-diagonal blowup).
    def motif_conv(slab, s):                                   # slab (Q, HD) f32
        shifted = [_shift_rows(slab, k - pad) for k in range(conv_k)]
        outs = []
        for h in range(n_head):
            lo = h * d_head
            lhs = jnp.concatenate(
                [sh[:, lo:lo + d_head] for sh in shifted], axis=1).astype(mxu)
            outs.append(jnp.dot(lhs, taps_ref[s],
                                preferred_element_type=f32))   # (Q, D)
        return jnp.concatenate(outs, axis=1) + cbias_ref[s:s + 1, :]

    q_c = motif_conv(w_heads[:, 0:HD], 0)
    k_c = motif_conv(w_heads[:, HD:2 * HD], 1)
    v_c = motif_conv(w_heads[:, 2 * HD:3 * HD], 2)

    # --- attention: per-head (Q, R) scores for this batch element ------------
    # scale folded into the biased queries (exact: scale is a power of two).
    rw_q = ((q_c + qbias_ref[0:1, :]) * scale).astype(mxu)
    rr_q = ((q_c + qbias_ref[1:2, :]) * scale).astype(mxu)
    k_m = k_c.astype(mxu)
    v_m = v_c.astype(mxu)
    rk_m = r_head_k.astype(mxu)

    # head-invariant index arithmetic / masks, hoisted out of the head loop
    qi = jax.lax.broadcasted_iota(jnp.int32, (Q, R), 0)
    kj = jax.lax.broadcasted_iota(jnp.int32, (Q, R), 1)
    rel = kj - qi + (R - 1)                 # source column of the rel-shift
    rel_hit = [rel == t for t in range(R)]
    if mask_mode == "causal":
        masked = kj > qi                    # built in-kernel: no mask DMA
    else:
        masked = mask_ref[0] != 0           # compact int8 (Q, R) mask
    neg_big = jnp.float32(-1e30)            # finite fill: no NaN rows

    head_outs = []
    for h in range(n_head):
        cols = slice(h * d_head, (h + 1) * d_head)
        ac = jax.lax.dot_general(rw_q[:, cols], k_m[:, cols], dn_t,
                                 preferred_element_type=f32)       # (Q, R)
        bd_pre = jax.lax.dot_general(rr_q[:, cols], rk_m[:, cols], dn_t,
                                     preferred_element_type=f32)   # (Q, R)
        # rel-shift: BD[i, j] = bd_pre[i, j - i + R - 1] for j <= i (j > i is
        # always covered by the attention mask).  O(R) selects on a (Q, R)
        # tile with hoisted masks; at large R switch to the strided
        # pltpu.roll(bd_pre, 1, axis=1, stride=1, stride_axis=0) form.
        bd = jnp.zeros((Q, R), f32)
        for t in range(R):
            bd = jnp.where(rel_hit[t], bd_pre[:, t:t + 1], bd)
        score = jnp.where(masked, neg_big, ac + bd)
        m_row = jnp.max(score, axis=-1, keepdims=True)
        p = jnp.exp(score - m_row)
        p = p / jnp.sum(p, axis=-1, keepdims=True)   # exact division (parity)
        head_outs.append(jnp.dot(p.astype(mxu), v_m[:, cols],
                                 preferred_element_type=f32))      # (Q, D)

    # --- o_net fused over heads + residual + LayerNorm ------------------------
    attn_vec = jnp.concatenate(head_outs, axis=1).astype(mxu)      # (Q, HD)
    attn_out = jnp.dot(attn_vec, wo_ref[...], preferred_element_type=f32)

    z = x + attn_out
    mu = jnp.mean(z, axis=-1, keepdims=True)
    var = jnp.mean(jnp.square(z - mu), axis=-1, keepdims=True)
    z_hat = (z - mu) * jax.lax.rsqrt(var + eps)
    o_ref[0] = (z_hat * ln_ref[0:1, :] + ln_ref[1:2, :]).astype(o_ref.dtype)


# ---------------------------------- wrapper -----------------------------------
def decoder_layer_forward(packed, dec_inp, r, r_w_bias, r_r_bias,
                          dec_attn_mask=None, mems=None, causal=False):
    """Forward of RelPartialLearnableDecoderLayer (eval mode, mems=None).

    causal=True builds the standard j > i mask in-kernel (no mask DMA);
    otherwise a torch-style 2-D / 3-D dec_attn_mask is required and is shipped
    as a compact per-batch int8 (Q, R) tile.  Any supplied mask must cover the
    j > i triangle (standard Transformer-XL usage)."""
    if mems is not None:
        raise NotImplementedError("mems path (klen > qlen)")   # TODO(synk)
    Q, B, Dm = dec_inp.shape
    R = r.shape[0]
    H, D, K = N_HEAD, D_HEAD, CONV_SIZE
    HD = H * D
    assert R == Q, "rlen must equal klen (mems=None)"
    assert Dm == D_MODEL and r.shape[1] == Dm

    x_bqd = jnp.transpose(dec_inp, (1, 0, 2))                  # (B, Q, Dm)
    qbias = jnp.concatenate([r_w_bias.reshape(1, HD),
                             r_r_bias.reshape(1, HD)], axis=0)  # (2, HD) f32

    if causal:
        mask_mode = "causal"
        extra_inputs, extra_specs = [], []
    else:
        if dec_attn_mask is None:
            raise NotImplementedError("dec_attn_mask=None")     # TODO(synk)
        mask_mode = "tensor"
        m = dec_attn_mask
        if m.ndim == 2:          # torch broadcast: (klen, bsz) over qlen
            mb = jnp.broadcast_to(jnp.transpose(m)[:, None, :], (B, Q, R))
        else:                    # (qlen, klen, 1|bsz)
            mb = jnp.broadcast_to(jnp.transpose(m, (2, 0, 1)), (B, Q, R))
        extra_inputs = [mb.astype(jnp.int8)]
        extra_specs = [pl.BlockSpec((1, Q, R), lambda b: (b, 0, 0))]

    kernel = functools.partial(
        _decoder_layer_kernel, n_head=H, d_head=D, conv_k=K,
        scale=SCALE, eps=LN_EPS, mask_mode=mask_mode)

    inputs = [x_bqd, packed["wqkv_t"], r, packed["wr_t"], packed["taps"],
              packed["conv_bias"], qbias, packed["wo_t"], packed["ln"]]
    in_specs = [
        pl.BlockSpec((1, Q, Dm), lambda b: (b, 0, 0)),      # x (per batch)
        pl.BlockSpec((Dm, 3 * HD), lambda b: (0, 0)),       # qkv_net.weight^T
        pl.BlockSpec((R, Dm), lambda b: (0, 0)),            # r
        pl.BlockSpec((Dm, HD), lambda b: (0, 0)),           # r_net.weight^T
        pl.BlockSpec((3, K * D, D), lambda b: (0, 0, 0)),   # conv taps (compact)
        pl.BlockSpec((3, HD), lambda b: (0, 0)),            # conv biases
        pl.BlockSpec((2, HD), lambda b: (0, 0)),            # r_w_bias / r_r_bias
        pl.BlockSpec((HD, Dm), lambda b: (0, 0)),           # o_net.weight^T
        pl.BlockSpec((2, Dm), lambda b: (0, 0)),            # LayerNorm gamma/beta
    ] + extra_specs
    inputs += extra_inputs

    # Per-step working set (~0.5 MiB with double buffering) is far below the
    # scoped-VMEM default on every generation (v7x: 64 MiB physical).  At real
    # sizes add a query-block grid axis so Pallas pipelines K/V/r tiles and
    # re-budget tiles / vmem_limit_bytes against the target chip.
    out = pl.pallas_call(
        kernel,
        grid=(B,),
        in_specs=in_specs,
        out_specs=pl.BlockSpec((1, Q, Dm), lambda b: (b, 0, 0)),
        out_shape=jax.ShapeDtypeStruct((B, Q, Dm), dec_inp.dtype),
        compiler_params=pltpu.CompilerParams(
            # batch steps are independent -> shards across v7x's 2 TensorCores
            dimension_semantics=("parallel",)),
    )(*inputs)
    return jnp.transpose(out, (1, 0, 2))                       # (Q, B, Dm)


# --------------------------------- parameters ----------------------------------
def init_params(key):
    """Parameters in the original torch layouts (torch default inits)."""
    ks = jax.random.split(key, 9)
    H, D, Dm, K = N_HEAD, D_HEAD, D_MODEL, CONV_SIZE

    def u(k, shape, fan_in):
        bound = 1.0 / (fan_in ** 0.5)
        return jax.random.uniform(k, shape, jnp.float32, -bound, bound)

    return {
        "w_qkv": u(ks[0], (3 * H * D, Dm), Dm),       # qkv_net.weight (no bias)
        "w_r":   u(ks[1], (H * D, Dm), Dm),           # r_net.weight   (no bias)
        "w_o":   u(ks[2], (Dm, H * D), H * D),        # o_net.weight   (no bias)
        "w_cq":  u(ks[3], (D, D, K), D * K), "b_cq": u(ks[4], (D,), D * K),
        "w_ck":  u(ks[5], (D, D, K), D * K), "b_ck": u(ks[6], (D,), D * K),
        "w_cv":  u(ks[7], (D, D, K), D * K), "b_cv": u(ks[8], (D,), D * K),
        "ln_g":  jnp.ones((Dm,), jnp.float32),
        "ln_b":  jnp.zeros((Dm,), jnp.float32),
    }


def pack_params(p):
    """One-time conversion to kernel-ready layouts (no per-call transposes).

    Conv taps: (3, K*D, D) with block k = w[:, :, k].T, so each head applies
    the whole conv window as a single deep matmul."""
    H, K = N_HEAD, CONV_SIZE

    def cat_taps(w):                                   # (Cout, Cin, K)
        return jnp.concatenate([w[:, :, k].T for k in range(K)], axis=0)

    return {
        "wqkv_t": p["w_qkv"].T.astype(MXU_DTYPE),              # (Dm, 3HD)
        "wr_t":   p["w_r"].T.astype(MXU_DTYPE),                # (Dm, HD)
        "wo_t":   p["w_o"].T.astype(MXU_DTYPE),                # (HD, Dm)
        "taps":   jnp.stack([cat_taps(p["w_cq"]), cat_taps(p["w_ck"]),
                             cat_taps(p["w_cv"])], 0).astype(MXU_DTYPE),
        "conv_bias": jnp.stack([jnp.tile(p["b_cq"], H), jnp.tile(p["b_ck"], H),
                                jnp.tile(p["b_cv"], H)], axis=0),   # (3, HD)
        "ln": jnp.stack([p["ln_g"], p["ln_b"]], axis=0),            # (2, Dm)
    }


# ----------------------------- pure-JAX reference -------------------------------
def _rel_shift_ref(x):
    """Exact torch _rel_shift on (qlen, rlen, B, H)."""
    Qq, Rr = x.shape[0], x.shape[1]
    zp = jnp.zeros((Qq, 1) + x.shape[2:], x.dtype)
    xp = jnp.concatenate([zp, x], axis=1)
    xp = xp.reshape((Rr + 1, Qq) + x.shape[2:])
    return xp[1:].reshape(x.shape)


def reference_forward(p, dec_inp, r, r_w_bias, r_r_bias, dec_attn_mask,
                      matmul_dtype=jnp.float32):
    """Pure-JAX mirror of the torch module (eval mode, mems=None, conv path).

    matmul_dtype reproduces the kernel's mixed-precision policy (bf16 MXU
    operands, f32 accumulation) for a tight matched-precision comparison."""
    f32 = jnp.float32
    Q, B, _ = dec_inp.shape
    H, D, K = N_HEAD, D_HEAD, CONV_SIZE
    R = r.shape[0]
    md = matmul_dtype

    def mm(a, b):
        return jnp.dot(a.astype(md), b.astype(md), preferred_element_type=f32)

    w_heads = mm(dec_inp, p["w_qkv"].T)                      # (Q, B, 3HD)
    r_head_k = mm(r, p["w_r"].T).reshape(R, H, D)
    w_q, w_k, w_v = jnp.split(w_heads, 3, axis=-1)

    def conv(x, w, b):
        L = x.shape[0]
        xt = jnp.transpose(x.reshape(L, B, H, D), (2, 1, 3, 0)).reshape(H * B, D, L)
        xp = jnp.pad(xt, ((0, 0), (0, 0), (K // 2, K // 2)))
        out = jnp.zeros((H * B, D, L), f32)
        for k in range(K):
            out = out + jnp.einsum('oc,ncl->nol', w[:, :, k].astype(md),
                                   xp[:, :, k:k + L].astype(md),
                                   preferred_element_type=f32)
        out = out + b[None, :, None]
        return jnp.transpose(out.reshape(H, B, D, L), (3, 1, 0, 2))   # (L,B,H,D)

    q = conv(w_q, p["w_cq"], p["b_cq"])
    k_ = conv(w_k, p["w_ck"], p["b_ck"])
    v = conv(w_v, p["w_cv"], p["b_cv"])

    AC = jnp.einsum('ibnd,jbnd->ijbn', (q + r_w_bias).astype(md), k_.astype(md),
                    preferred_element_type=f32)
    BD = jnp.einsum('ibnd,jnd->ijbn', (q + r_r_bias).astype(md),
                    r_head_k.astype(md), preferred_element_type=f32)
    BD = _rel_shift_ref(BD)
    score = (AC + BD) * SCALE
    if dec_attn_mask is not None:
        m = dec_attn_mask
        m4 = m[None, :, :, None] if m.ndim == 2 else m[:, :, :, None]
        score = jnp.where(m4, -jnp.inf, score)
    prob = jax.nn.softmax(score, axis=1)
    attn_vec = jnp.einsum('ijbn,jbnd->ibnd', prob.astype(md), v.astype(md),
                          preferred_element_type=f32).reshape(Q, B, H * D)
    z = dec_inp + mm(attn_vec, p["w_o"].T)
    mu = z.mean(-1, keepdims=True)
    var = ((z - mu) ** 2).mean(-1, keepdims=True)
    return (z - mu) / jnp.sqrt(var + LN_EPS) * p["ln_g"] + p["ln_b"]


# ------------------------------------ main --------------------------------------
if __name__ == "__main__":
    key = jax.random.PRNGKey(0)
    kp, kw, kr, kb1, kb2 = jax.random.split(key, 5)
    params = init_params(kp)
    packed = pack_params(params)

    dec_inp = jax.random.normal(kw, (QLEN, BSZ, D_MODEL), jnp.float32)
    r = jax.random.normal(kr, (QLEN, D_MODEL), jnp.float32)
    r_w_bias = 0.1 * jax.random.normal(kb1, (N_HEAD, D_HEAD), jnp.float32)
    r_r_bias = 0.1 * jax.random.normal(kb2, (N_HEAD, D_HEAD), jnp.float32)

    # standard Transformer-XL causal mask: key position j > query position i
    i_idx = jnp.arange(QLEN)[:, None]
    j_idx = jnp.arange(QLEN)[None, :]
    dec_attn_mask = (j_idx > i_idx)[:, :, None]          # (qlen, klen, 1) bool

    # causal path: mask generated in-kernel from iota
    fwd_causal = jax.jit(functools.partial(decoder_layer_forward, causal=True))
    out = jax.block_until_ready(fwd_causal(packed, dec_inp, r, r_w_bias, r_r_bias))
    assert out.shape == (QLEN, BSZ, D_MODEL)
    assert bool(jnp.all(jnp.isfinite(out)))

    # matched-precision reference (bf16 MXU operands, f32 accumulation): tight
    # structural check; pure-f32 reference: semantic sanity vs the torch math.
    ref_mixed = reference_forward(params, dec_inp, r, r_w_bias, r_r_bias,
                                  dec_attn_mask, matmul_dtype=MXU_DTYPE)
    ref_f32 = reference_forward(params, dec_inp, r, r_w_bias, r_r_bias,
                                dec_attn_mask, matmul_dtype=jnp.float32)
    err_mixed = float(jnp.max(jnp.abs(out - ref_mixed)))
    err_f32 = float(jnp.max(jnp.abs(out - ref_f32)))
    assert err_mixed < 2e-2, f"kernel vs matched-precision reference: {err_mixed}"
    assert err_f32 < 1e-1, f"kernel vs f32 reference: {err_f32}"

    # tensor-mask path: compact per-batch int8 mask DMA'd and expanded in-kernel
    fwd_mask = jax.jit(decoder_layer_forward)
    out2 = jax.block_until_ready(
        fwd_mask(packed, dec_inp, r, r_w_bias, r_r_bias,
                 dec_attn_mask=dec_attn_mask))
    err2 = float(jnp.max(jnp.abs(out2 - ref_mixed)))
    assert err2 < 2e-2, f"tensor-mask path vs reference: {err2}"

    print("KERNEL_OK")
</pallas_src>

<mosaic_0001>
module attributes {stable_mosaic.version = 11 : i64} {
  func.func @_decoder_layer_kernel(%arg0: i32, %arg1: memref<1x8x128xf32, #tpu.memory_space<vmem>>, %arg2: memref<128x384xbf16, #tpu.memory_space<vmem>>, %arg3: memref<8x128xf32, #tpu.memory_space<vmem>>, %arg4: memref<128x128xbf16, #tpu.memory_space<vmem>>, %arg5: memref<3x448x64xbf16, #tpu.memory_space<vmem>>, %arg6: memref<3x128xf32, #tpu.memory_space<vmem>>, %arg7: memref<2x128xf32, #tpu.memory_space<vmem>>, %arg8: memref<128x128xbf16, #tpu.memory_space<vmem>>, %arg9: memref<2x128xf32, #tpu.memory_space<vmem>>, %arg10: memref<1x8x128xf32, #tpu.memory_space<vmem>>) attributes {dimension_semantics = [#tpu.dimension_semantics<parallel>], iteration_bounds = array<i64: 2>, scalar_prefetch = 0 : i64, scratch_operands = 0 : i64, tpu.core_type = #tpu.core_type<tc>, window_params = [{transform_indices = @transform_0, window_bounds = array<i64: 1, 8, 128>}, {pipeline_mode = #tpu.pipeline_mode<synchronous>, transform_indices = @transform_1, window_bounds = array<i64: 128, 384>}, {pipeline_mode = #tpu.pipeline_mode<synchronous>, transform_indices = @transform_2, window_bounds = array<i64: 8, 128>}, {pipeline_mode = #tpu.pipeline_mode<synchronous>, transform_indices = @transform_3, window_bounds = array<i64: 128, 128>}, {pipeline_mode = #tpu.pipeline_mode<synchronous>, transform_indices = @transform_4, window_bounds = array<i64: 3, 448, 64>}, {pipeline_mode = #tpu.pipeline_mode<synchronous>, transform_indices = @transform_5, window_bounds = array<i64: 3, 128>}, {pipeline_mode = #tpu.pipeline_mode<synchronous>, transform_indices = @transform_6, window_bounds = array<i64: 2, 128>}, {pipeline_mode = #tpu.pipeline_mode<synchronous>, transform_indices = @transform_7, window_bounds = array<i64: 128, 128>}, {pipeline_mode = #tpu.pipeline_mode<synchronous>, transform_indices = @transform_8, window_bounds = array<i64: 2, 128>}, {transform_indices = @transform_9, window_bounds = array<i64: 1, 8, 128>}]} {
    %c0 = arith.constant 0 : index
    %c0_0 = arith.constant 0 : index
    %c0_1 = arith.constant 0 : index
    %0 = vector.load %arg1[%c0, %c0_0, %c0_1] : memref<1x8x128xf32, #tpu.memory_space<vmem>>, vector<1x8x128xf32>
    %1 = vector.shape_cast %0 : vector<1x8x128xf32> to vector<8x128xf32>
    %2 = arith.truncf %1 : vector<8x128xf32> to vector<8x128xbf16>
    %c0_2 = arith.constant 0 : index
    %c0_3 = arith.constant 0 : index
    %3 = vector.load %arg2[%c0_2, %c0_3] : memref<128x384xbf16, #tpu.memory_space<vmem>>, vector<128x384xbf16>
    %cst = arith.constant dense<0.000000e+00> : vector<8x384xf32>
    %4 = tpu.matmul %2, %3, %cst {dimension_numbers = #tpu.dot_dimension_numbers<[1], [0], [0], [1], [0, 0, 1, 1], [], []>} : vector<8x128xbf16>, vector<128x384xbf16>, vector<8x384xf32> -> vector<8x384xf32>
    %c0_4 = arith.constant 0 : index
    %c0_5 = arith.constant 0 : index
    %5 = vector.load %arg3[%c0_4, %c0_5] : memref<8x128xf32, #tpu.memory_space<vmem>>, vector<8x128xf32>
    %6 = arith.truncf %5 : vector<8x128xf32> to vector<8x128xbf16>
    %c0_6 = arith.constant 0 : index
    %c0_7 = arith.constant 0 : index
    %7 = vector.load %arg4[%c0_6, %c0_7] : memref<128x128xbf16, #tpu.memory_space<vmem>>, vector<128x128xbf16>
    %cst_8 = arith.constant dense<0.000000e+00> : vector<8x128xf32>
    %8 = tpu.matmul %6, %7, %cst_8 {dimension_numbers = #tpu.dot_dimension_numbers<[1], [0], [0], [1], [0, 0, 1, 1], [], []>} : vector<8x128xbf16>, vector<128x128xbf16>, vector<8x128xf32> -> vector<8x128xf32>
    %9 = vector.extract_strided_slice %4 {offsets = [0, 0], sizes = [8, 128], strides = [1, 1]} : vector<8x384xf32> to vector<8x128xf32>
    %cst_9 = arith.constant 0.000000e+00 : f32
    %10 = vector.broadcast %cst_9 : f32 to vector<3x128xf32>
    %11 = vector.extract_strided_slice %9 {offsets = [0, 0], sizes = [5, 128], strides = [1, 1]} : vector<8x128xf32> to vector<5x128xf32>
    %12 = tpu.concatenate %10, %11 in 0 : vector<3x128xf32>, vector<5x128xf32> -> vector<8x128xf32>
    %cst_10 = arith.constant 0.000000e+00 : f32
    %13 = vector.broadcast %cst_10 : f32 to vector<2x128xf32>
    %14 = vector.extract_strided_slice %9 {offsets = [0, 0], sizes = [6, 128], strides = [1, 1]} : vector<8x128xf32> to vector<6x128xf32>
    %15 = tpu.concatenate %13, %14 in 0 : vector<2x128xf32>, vector<6x128xf32> -> vector<8x128xf32>
    %cst_11 = arith.constant 0.000000e+00 : f32
    %16 = vector.broadcast %cst_11 : f32 to vector<1x128xf32>
    %17 = vector.extract_strided_slice %9 {offsets = [0, 0], sizes = [7, 128], strides = [1, 1]} : vector<8x128xf32> to vector<7x128xf32>
    %18 = tpu.concatenate %16, %17 in 0 : vector<1x128xf32>, vector<7x128xf32> -> vector<8x128xf32>
    %cst_12 = arith.constant 0.000000e+00 : f32
    %19 = vector.broadcast %cst_12 : f32 to vector<1x128xf32>
    %20 = vector.extract_strided_slice %9 {offsets = [1, 0], sizes = [7, 128], strides = [1, 1]} : vector<8x128xf32> to vector<7x128xf32>
    %21 = tpu.concatenate %20, %19 in 0 : vector<7x128xf32>, vector<1x128xf32> -> vector<8x128xf32>
    %cst_13 = arith.constant 0.000000e+00 : f32
    %22 = vector.broadcast %cst_13 : f32 to vector<2x128xf32>
    %23 = vector.extract_strided_slice %9 {offsets = [2, 0], sizes = [6, 128], strides = [1, 1]} : vector<8x128xf32> to vector<6x128xf32>
    %24 = tpu.concatenate %23, %22 in 0 : vector<6x128xf32>, vector<2x128xf32> -> vector<8x128xf32>
    %cst_14 = arith.constant 0.000000e+00 : f32
    %25 = vector.broadcast %cst_14 : f32 to vector<3x128xf32>
    %26 = vector.extract_strided_slice %9 {offsets = [3, 0], sizes = [5, 128], strides = [1, 1]} : vector<8x128xf32> to vector<5x128xf32>
    %27 = tpu.concatenate %26, %25 in 0 : vector<5x128xf32>, vector<3x128xf32> -> vector<8x128xf32>
    %28 = vector.extract_strided_slice %12 {offsets = [0, 0], sizes = [8, 64], strides = [1, 1]} : vector<8x128xf32> to vector<8x64xf32>
    %29 = vector.extract_strided_slice %15 {offsets = [0, 0], sizes = [8, 64], strides = [1, 1]} : vector<8x128xf32> to vector<8x64xf32>
    %30 = vector.extract_strided_slice %18 {offsets = [0, 0], sizes = [8, 64], strides = [1, 1]} : vector<8x128xf32> to vector<8x64xf32>
    %31 = vector.extract_strided_slice %9 {offsets = [0, 0], sizes = [8, 64], strides = [1, 1]} : vector<8x128xf32> to vector<8x64xf32>
    %32 = vector.extract_strided_slice %21 {offsets = [0, 0], sizes = [8, 64], strides = [1, 1]} : vector<8x128xf32> to vector<8x64xf32>
    %33 = vector.extract_strided_slice %24 {offsets = [0, 0], sizes = [8, 64], strides = [1, 1]} : vector<8x128xf32> to vector<8x64xf32>
    %34 = vector.extract_strided_slice %27 {offsets = [0, 0], sizes = [8, 64], strides = [1, 1]} : vector<8x128xf32> to vector<8x64xf32>
    %35 = tpu.concatenate %28, %29, %30, %31, %32, %33, %34 in 1 : vector<8x64xf32>, vector<8x64xf32>, vector<8x64xf32>, vector<8x64xf32>, vector<8x64xf32>, vector<8x64xf32>, vector<8x64xf32> -> vector<8x448xf32>
    %36 = arith.truncf %35 : vector<8x448xf32> to vector<8x448xbf16>
    %c0_15 = arith.constant 0 : index
    %c0_16 = arith.constant 0 : index
    %c0_17 = arith.constant 0 : index
    %37 = vector.load %arg5[%c0_15, %c0_16, %c0_17] : memref<3x448x64xbf16, #tpu.memory_space<vmem>>, vector<1x448x64xbf16>
    %38 = vector.shape_cast %37 : vector<1x448x64xbf16> to vector<448x64xbf16>
    %cst_18 = arith.constant dense<0.000000e+00> : vector<8x64xf32>
    %39 = tpu.matmul %36, %38, %cst_18 {dimension_numbers = #tpu.dot_dimension_numbers<[1], [0], [0], [1], [0, 0, 1, 1], [], []>} : vector<8x448xbf16>, vector<448x64xbf16>, vector<8x64xf32> -> vector<8x64xf32>
    %40 = vector.extract_strided_slice %12 {offsets = [0, 64], sizes = [8, 64], strides = [1, 1]} : vector<8x128xf32> to vector<8x64xf32>
    %41 = vector.extract_strided_slice %15 {offsets = [0, 64], sizes = [8, 64], strides = [1, 1]} : vector<8x128xf32> to vector<8x64xf32>
    %42 = vector.extract_strided_slice %18 {offsets = [0, 64], sizes = [8, 64], strides = [1, 1]} : vector<8x128xf32> to vector<8x64xf32>
    %43 = vector.extract_strided_slice %9 {offsets = [0, 64], sizes = [8, 64], strides = [1, 1]} : vector<8x128xf32> to vector<8x64xf32>
    %44 = vector.extract_strided_slice %21 {offsets = [0, 64], sizes = [8, 64], strides = [1, 1]} : vector<8x128xf32> to vector<8x64xf32>
    %45 = vector.extract_strided_slice %24 {offsets = [0, 64], sizes = [8, 64], strides = [1, 1]} : vector<8x128xf32> to vector<8x64xf32>
    %46 = vector.extract_strided_slice %27 {offsets = [0, 64], sizes = [8, 64], strides = [1, 1]} : vector<8x128xf32> to vector<8x64xf32>
    %47 = tpu.concatenate %40, %41, %42, %43, %44, %45, %46 in 1 : vector<8x64xf32>, vector<8x64xf32>, vector<8x64xf32>, vector<8x64xf32>, vector<8x64xf32>, vector<8x64xf32>, vector<8x64xf32> -> vector<8x448xf32>
    %48 = arith.truncf %47 : vector<8x448xf32> to vector<8x448xbf16>
    %c0_19 = arith.constant 0 : index
    %c0_20 = arith.constant 0 : index
    %c0_21 = arith.constant 0 : index
    %49 = vector.load %arg5[%c0_19, %c0_20, %c0_21] : memref<3x448x64xbf16, #tpu.memory_space<vmem>>, vector<1x448x64xbf16>
    %50 = vector.shape_cast %49 : vector<1x448x64xbf16> to vector<448x64xbf16>
    %cst_22 = arith.constant dense<0.000000e+00> : vector<8x64xf32>
    %51 = tpu.matmul %48, %50, %cst_22 {dimension_numbers = #tpu.dot_dimension_numbers<[1], [0], [0], [1], [0, 0, 1, 1], [], []>} : vector<8x448xbf16>, vector<448x64xbf16>, vector<8x64xf32> -> vector<8x64xf32>
    %52 = tpu.concatenate %39, %51 in 1 : vector<8x64xf32>, vector<8x64xf32> -> vector<8x128xf32>
    %c0_23 = arith.constant 0 : index
    %c0_24 = arith.constant 0 : index
    %53 = vector.load %arg6[%c0_23, %c0_24] : memref<3x128xf32, #tpu.memory_space<vmem>>, vector<1x128xf32>
    %54 = vector.broadcast %53 : vector<1x128xf32> to vector<8x128xf32>
    %55 = arith.addf %52, %54 : vector<8x128xf32>
    %56 = vector.extract_strided_slice %4 {offsets = [0, 128], sizes = [8, 128], strides = [1, 1]} : vector<8x384xf32> to vector<8x128xf32>
    %cst_25 = arith.constant 0.000000e+00 : f32
    %57 = vector.broadcast %cst_25 : f32 to vector<3x128xf32>
    %58 = vector.extract_strided_slice %56 {offsets = [0, 0], sizes = [5, 128], strides = [1, 1]} : vector<8x128xf32> to vector<5x128xf32>
    %59 = tpu.concatenate %57, %58 in 0 : vector<3x128xf32>, vector<5x128xf32> -> vector<8x128xf32>
    %cst_26 = arith.constant 0.000000e+00 : f32
    %60 = vector.broadcast %cst_26 : f32 to vector<2x128xf32>
    %61 = vector.extract_strided_slice %56 {offsets = [0, 0], sizes = [6, 128], strides = [1, 1]} : vector<8x128xf32> to vector<6x128xf32>
    %62 = tpu.concatenate %60, %61 in 0 : vector<2x128xf32>, vector<6x128xf32> -> vector<8x128xf32>
    %cst_27 = arith.constant 0.000000e+00 : f32
    %63 = vector.broadcast %cst_27 : f32 to vector<1x128xf32>
    %64 = vector.extract_strided_slice %56 {offsets = [0, 0], sizes = [7, 128], strides = [1, 1]} : vector<8x128xf32> to vector<7x128xf32>
    %65 = tpu.concatenate %63, %64 in 0 : vector<1x128xf32>, vector<7x128xf32> -> vector<8x128xf32>
    %cst_28 = arith.constant 0.000000e+00 : f32
    %66 = vector.broadcast %cst_28 : f32 to vector<1x128xf32>
    %67 = vector.extract_strided_slice %56 {offsets = [1, 0], sizes = [7, 128], strides = [1, 1]} : vector<8x128xf32> to vector<7x128xf32>
    %68 = tpu.concatenate %67, %66 in 0 : vector<7x128xf32>, vector<1x128xf32> -> vector<8x128xf32>
    %cst_29 = arith.constant 0.000000e+00 : f32
    %69 = vector.broadcast %cst_29 : f32 to vector<2x128xf32>
    %70 = vector.extract_strided_slice %56 {offsets = [2, 0], sizes = [6, 128], strides = [1, 1]} : vector<8x128xf32> to vector<6x128xf32>
    %71 = tpu.concatenate %70, %69 in 0 : vector<6x128xf32>, vector<2x128xf32> -> vector<8x128xf32>
    %cst_30 = arith.constant 0.000000e+00 : f32
    %72 = vector.broadcast %cst_30 : f32 to vector<3x128xf32>
    %73 = vector.extract_strided_slice %56 {offsets = [3, 0], sizes = [5, 128], strides = [1, 1]} : vector<8x128xf32> to vector<5x128xf32>
    %74 = tpu.concatenate %73, %72 in 0 : vector<5x128xf32>, vector<3x128xf32> -> vector<8x128xf32>
    %75 = vector.extract_strided_slice %59 {offsets = [0, 0], sizes = [8, 64], strides = [1, 1]} : vector<8x128xf32> to vector<8x64xf32>
    %76 = vector.extract_strided_slice %62 {offsets = [0, 0], sizes = [8, 64], strides = [1, 1]} : vector<8x128xf32> to vector<8x64xf32>
    %77 = vector.extract_strided_slice %65 {offsets = [0, 0], sizes = [8, 64], strides = [1, 1]} : vector<8x128xf32> to vector<8x64xf32>
    %78 = vector.extract_strided_slice %56 {offsets = [0, 0], sizes = [8, 64], strides = [1, 1]} : vector<8x128xf32> to vector<8x64xf32>
    %79 = vector.extract_strided_slice %68 {offsets = [0, 0], sizes = [8, 64], strides = [1, 1]} : vector<8x128xf32> to vector<8x64xf32>
    %80 = vector.extract_strided_slice %71 {offsets = [0, 0], sizes = [8, 64], strides = [1, 1]} : vector<8x128xf32> to vector<8x64xf32>
    %81 = vector.extract_strided_slice %74 {offsets = [0, 0], sizes = [8, 64], strides = [1, 1]} : vector<8x128xf32> to vector<8x64xf32>
    %82 = tpu.concatenate %75, %76, %77, %78, %79, %80, %81 in 1 : vector<8x64xf32>, vector<8x64xf32>, vector<8x64xf32>, vector<8x64xf32>, vector<8x64xf32>, vector<8x64xf32>, vector<8x64xf32> -> vector<8x448xf32>
    %83 = arith.truncf %82 : vector<8x448xf32> to vector<8x448xbf16>
    %c1 = arith.constant 1 : index
    %c0_31 = arith.constant 0 : index
    %c0_32 = arith.constant 0 : index
    %84 = vector.load %arg5[%c1, %c0_31, %c0_32] : memref<3x448x64xbf16, #tpu.memory_space<vmem>>, vector<1x448x64xbf16>
    %85 = vector.shape_cast %84 : vector<1x448x64xbf16> to vector<448x64xbf16>
    %cst_33 = arith.constant dense<0.000000e+00> : vector<8x64xf32>
    %86 = tpu.matmul %83, %85, %cst_33 {dimension_numbers = #tpu.dot_dimension_numbers<[1], [0], [0], [1], [0, 0, 1, 1], [], []>} : vector<8x448xbf16>, vector<448x64xbf16>, vector<8x64xf32> -> vector<8x64xf32>
    %87 = vector.extract_strided_slice %59 {offsets = [0, 64], sizes = [8, 64], strides = [1, 1]} : vector<8x128xf32> to vector<8x64xf32>
    %88 = vector.extract_strided_slice %62 {offsets = [0, 64], sizes = [8, 64], strides = [1, 1]} : vector<8x128xf32> to vector<8x64xf32>
    %89 = vector.extract_strided_slice %65 {offsets = [0, 64], sizes = [8, 64], strides = [1, 1]} : vector<8x128xf32> to vector<8x64xf32>
    %90 = vector.extract_strided_slice %56 {offsets = [0, 64], sizes = [8, 64], strides = [1, 1]} : vector<8x128xf32> to vector<8x64xf32>
    %91 = vector.extract_strided_slice %68 {offsets = [0, 64], sizes = [8, 64], strides = [1, 1]} : vector<8x128xf32> to vector<8x64xf32>
    %92 = vector.extract_strided_slice %71 {offsets = [0, 64], sizes = [8, 64], strides = [1, 1]} : vector<8x128xf32> to vector<8x64xf32>
    %93 = vector.extract_strided_slice %74 {offsets = [0, 64], sizes = [8, 64], strides = [1, 1]} : vector<8x128xf32> to vector<8x64xf32>
    %94 = tpu.concatenate %87, %88, %89, %90, %91, %92, %93 in 1 : vector<8x64xf32>, vector<8x64xf32>, vector<8x64xf32>, vector<8x64xf32>, vector<8x64xf32>, vector<8x64xf32>, vector<8x64xf32> -> vector<8x448xf32>
    %95 = arith.truncf %94 : vector<8x448xf32> to vector<8x448xbf16>
    %c1_34 = arith.constant 1 : index
    %c0_35 = arith.constant 0 : index
    %c0_36 = arith.constant 0 : index
    %96 = vector.load %arg5[%c1_34, %c0_35, %c0_36] : memref<3x448x64xbf16, #tpu.memory_space<vmem>>, vector<1x448x64xbf16>
    %97 = vector.shape_cast %96 : vector<1x448x64xbf16> to vector<448x64xbf16>
    %cst_37 = arith.constant dense<0.000000e+00> : vector<8x64xf32>
    %98 = tpu.matmul %95, %97, %cst_37 {dimension_numbers = #tpu.dot_dimension_numbers<[1], [0], [0], [1], [0, 0, 1, 1], [], []>} : vector<8x448xbf16>, vector<448x64xbf16>, vector<8x64xf32> -> vector<8x64xf32>
    %99 = tpu.concatenate %86, %98 in 1 : vector<8x64xf32>, vector<8x64xf32> -> vector<8x128xf32>
    %c1_38 = arith.constant 1 : index
    %c0_39 = arith.constant 0 : index
    %100 = vector.load %arg6[%c1_38, %c0_39] : memref<3x128xf32, #tpu.memory_space<vmem>>, vector<1x128xf32>
    %101 = vector.broadcast %100 : vector<1x128xf32> to vector<8x128xf32>
    %102 = arith.addf %99, %101 : vector<8x128xf32>
    %103 = vector.extract_strided_slice %4 {offsets = [0, 256], sizes = [8, 128], strides = [1, 1]} : vector<8x384xf32> to vector<8x128xf32>
    %cst_40 = arith.constant 0.000000e+00 : f32
    %104 = vector.broadcast %cst_40 : f32 to vector<3x128xf32>
    %105 = vector.extract_strided_slice %103 {offsets = [0, 0], sizes = [5, 128], strides = [1, 1]} : vector<8x128xf32> to vector<5x128xf32>
    %106 = tpu.concatenate %104, %105 in 0 : vector<3x128xf32>, vector<5x128xf32> -> vector<8x128xf32>
    %cst_41 = arith.constant 0.000000e+00 : f32
    %107 = vector.broadcast %cst_41 : f32 to vector<2x128xf32>
    %108 = vector.extract_strided_slice %103 {offsets = [0, 0], sizes = [6, 128], strides = [1, 1]} : vector<8x128xf32> to vector<6x128xf32>
    %109 = tpu.concatenate %107, %108 in 0 : vector<2x128xf32>, vector<6x128xf32> -> vector<8x128xf32>
    %cst_42 = arith.constant 0.000000e+00 : f32
    %110 = vector.broadcast %cst_42 : f32 to vector<1x128xf32>
    %111 = vector.extract_strided_slice %103 {offsets = [0, 0], sizes = [7, 128], strides = [1, 1]} : vector<8x128xf32> to vector<7x128xf32>
    %112 = tpu.concatenate %110, %111 in 0 : vector<1x128xf32>, vector<7x128xf32> -> vector<8x128xf32>
    %cst_43 = arith.constant 0.000000e+00 : f32
    %113 = vector.broadcast %cst_43 : f32 to vector<1x128xf32>
    %114 = vector.extract_strided_slice %103 {offsets = [1, 0], sizes = [7, 128], strides = [1, 1]} : vector<8x128xf32> to vector<7x128xf32>
    %115 = tpu.concatenate %114, %113 in 0 : vector<7x128xf32>, vector<1x128xf32> -> vector<8x128xf32>
    %cst_44 = arith.constant 0.000000e+00 : f32
    %116 = vector.broadcast %cst_44 : f32 to vector<2x128xf32>
    %117 = vector.extract_strided_slice %103 {offsets = [2, 0], sizes = [6, 128], strides = [1, 1]} : vector<8x128xf32> to vector<6x128xf32>
    %118 = tpu.concatenate %117, %116 in 0 : vector<6x128xf32>, vector<2x128xf32> -> vector<8x128xf32>
    %cst_45 = arith.constant 0.000000e+00 : f32
    %119 = vector.broadcast %cst_45 : f32 to vector<3x128xf32>
    %120 = vector.extract_strided_slice %103 {offsets = [3, 0], sizes = [5, 128], strides = [1, 1]} : vector<8x128xf32> to vector<5x128xf32>
    %121 = tpu.concatenate %120, %119 in 0 : vector<5x128xf32>, vector<3x128xf32> -> vector<8x128xf32>
    %122 = vector.extract_strided_slice %106 {offsets = [0, 0], sizes = [8, 64], strides = [1, 1]} : vector<8x128xf32> to vector<8x64xf32>
    %123 = vector.extract_strided_slice %109 {offsets = [0, 0], sizes = [8, 64], strides = [1, 1]} : vector<8x128xf32> to vector<8x64xf32>
    %124 = vector.extract_strided_slice %112 {offsets = [0, 0], sizes = [8, 64], strides = [1, 1]} : vector<8x128xf32> to vector<8x64xf32>
    %125 = vector.extract_strided_slice %103 {offsets = [0, 0], sizes = [8, 64], strides = [1, 1]} : vector<8x128xf32> to vector<8x64xf32>
    %126 = vector.extract_strided_slice %115 {offsets = [0, 0], sizes = [8, 64], strides = [1, 1]} : vector<8x128xf32> to vector<8x64xf32>
    %127 = vector.extract_strided_slice %118 {offsets = [0, 0], sizes = [8, 64], strides = [1, 1]} : vector<8x128xf32> to vector<8x64xf32>
    %128 = vector.extract_strided_slice %121 {offsets = [0, 0], sizes = [8, 64], strides = [1, 1]} : vector<8x128xf32> to vector<8x64xf32>
    %129 = tpu.concatenate %122, %123, %124, %125, %126, %127, %128 in 1 : vector<8x64xf32>, vector<8x64xf32>, vector<8x64xf32>, vector<8x64xf32>, vector<8x64xf32>, vector<8x64xf32>, vector<8x64xf32> -> vector<8x448xf32>
    %130 = arith.truncf %129 : vector<8x448xf32> to vector<8x448xbf16>
    %c2 = arith.constant 2 : index
    %c0_46 = arith.constant 0 : index
    %c0_47 = arith.constant 0 : index
    %131 = vector.load %arg5[%c2, %c0_46, %c0_47] : memref<3x448x64xbf16, #tpu.memory_space<vmem>>, vector<1x448x64xbf16>
    %132 = vector.shape_cast %131 : vector<1x448x64xbf16> to vector<448x64xbf16>
    %cst_48 = arith.constant dense<0.000000e+00> : vector<8x64xf32>
    %133 = tpu.matmul %130, %132, %cst_48 {dimension_numbers = #tpu.dot_dimension_numbers<[1], [0], [0], [1], [0, 0, 1, 1], [], []>} : vector<8x448xbf16>, vector<448x64xbf16>, vector<8x64xf32> -> vector<8x64xf32>
    %134 = vector.extract_strided_slice %106 {offsets = [0, 64], sizes = [8, 64], strides = [1, 1]} : vector<8x128xf32> to vector<8x64xf32>
    %135 = vector.extract_strided_slice %109 {offsets = [0, 64], sizes = [8, 64], strides = [1, 1]} : vector<8x128xf32> to vector<8x64xf32>
    %136 = vector.extract_strided_slice %112 {offsets = [0, 64], sizes = [8, 64], strides = [1, 1]} : vector<8x128xf32> to vector<8x64xf32>
    %137 = vector.extract_strided_slice %103 {offsets = [0, 64], sizes = [8, 64], strides = [1, 1]} : vector<8x128xf32> to vector<8x64xf32>
    %138 = vector.extract_strided_slice %115 {offsets = [0, 64], sizes = [8, 64], strides = [1, 1]} : vector<8x128xf32> to vector<8x64xf32>
    %139 = vector.extract_strided_slice %118 {offsets = [0, 64], sizes = [8, 64], strides = [1, 1]} : vector<8x128xf32> to vector<8x64xf32>
    %140 = vector.extract_strided_slice %121 {offsets = [0, 64], sizes = [8, 64], strides = [1, 1]} : vector<8x128xf32> to vector<8x64xf32>
    %141 = tpu.concatenate %134, %135, %136, %137, %138, %139, %140 in 1 : vector<8x64xf32>, vector<8x64xf32>, vector<8x64xf32>, vector<8x64xf32>, vector<8x64xf32>, vector<8x64xf32>, vector<8x64xf32> -> vector<8x448xf32>
    %142 = arith.truncf %141 : vector<8x448xf32> to vector<8x448xbf16>
    %c2_49 = arith.constant 2 : index
    %c0_50 = arith.constant 0 : index
    %c0_51 = arith.constant 0 : index
    %143 = vector.load %arg5[%c2_49, %c0_50, %c0_51] : memref<3x448x64xbf16, #tpu.memory_space<vmem>>, vector<1x448x64xbf16>
    %144 = vector.shape_cast %143 : vector<1x448x64xbf16> to vector<448x64xbf16>
    %cst_52 = arith.constant dense<0.000000e+00> : vector<8x64xf32>
    %145 = tpu.matmul %142, %144, %cst_52 {dimension_numbers = #tpu.dot_dimension_numbers<[1], [0], [0], [1], [0, 0, 1, 1], [], []>} : vector<8x448xbf16>, vector<448x64xbf16>, vector<8x64xf32> -> vector<8x64xf32>
    %146 = tpu.concatenate %133, %145 in 1 : vector<8x64xf32>, vector<8x64xf32> -> vector<8x128xf32>
    %c2_53 = arith.constant 2 : index
    %c0_54 = arith.constant 0 : index
    %147 = vector.load %arg6[%c2_53, %c0_54] : memref<3x128xf32, #tpu.memory_space<vmem>>, vector<1x128xf32>
    %148 = vector.broadcast %147 : vector<1x128xf32> to vector<8x128xf32>
    %149 = arith.addf %146, %148 : vector<8x128xf32>
    %c0_55 = arith.constant 0 : index
    %c0_56 = arith.constant 0 : index
    %150 = vector.load %arg7[%c0_55, %c0_56] : memref<2x128xf32, #tpu.memory_space<vmem>>, vector<1x128xf32>
    %151 = vector.broadcast %150 : vector<1x128xf32> to vector<8x128xf32>
    %152 = arith.addf %55, %151 : vector<8x128xf32>
    %cst_57 = arith.constant 1.250000e-01 : f32
    %153 = vector.broadcast %cst_57 : f32 to vector<8x128xf32>
    %154 = arith.mulf %152, %153 : vector<8x128xf32>
    %155 = arith.truncf %154 : vector<8x128xf32> to vector<8x128xbf16>
    %c1_58 = arith.constant 1 : index
    %c0_59 = arith.constant 0 : index
    %156 = vector.load %arg7[%c1_58, %c0_59] : memref<2x128xf32, #tpu.memory_space<vmem>>, vector<1x128xf32>
    %157 = vector.broadcast %156 : vector<1x128xf32> to vector<8x128xf32>
    %158 = arith.addf %55, %157 : vector<8x128xf32>
    %cst_60 = arith.constant 1.250000e-01 : f32
    %159 = vector.broadcast %cst_60 : f32 to vector<8x128xf32>
    %160 = arith.mulf %158, %159 : vector<8x128xf32>
    %161 = arith.truncf %160 : vector<8x128xf32> to vector<8x128xbf16>
    %162 = arith.truncf %102 : vector<8x128xf32> to vector<8x128xbf16>
    %163 = arith.truncf %149 : vector<8x128xf32> to vector<8x128xbf16>
    %164 = arith.truncf %8 : vector<8x128xf32> to vector<8x128xbf16>
    %165 = tpu.iota {dimensions = array<i32: 0>} : vector<8x8xi32>
    %166 = tpu.iota {dimensions = array<i32: 1>} : vector<8x8xi32>
    %167 = arith.subi %166, %165 : vector<8x8xi32>
    %c7_i32 = arith.constant 7 : i32
    %168 = vector.broadcast %c7_i32 : i32 to vector<8x8xi32>
    %169 = arith.addi %167, %168 : vector<8x8xi32>
    %c0_i32 = arith.constant 0 : i32
    %170 = vector.broadcast %c0_i32 : i32 to vector<8x8xi32>
    %171 = arith.cmpi eq, %169, %170 : vector<8x8xi32>
    %c1_i32 = arith.constant 1 : i32
    %172 = vector.broadcast %c1_i32 : i32 to vector<8x8xi32>
    %173 = arith.cmpi eq, %169, %172 : vector<8x8xi32>
    %c2_i32 = arith.constant 2 : i32
    %174 = vector.broadcast %c2_i32 : i32 to vector<8x8xi32>
    %175 = arith.cmpi eq, %169, %174 : vector<8x8xi32>
    %c3_i32 = arith.constant 3 : i32
    %176 = vector.broadcast %c3_i32 : i32 to vector<8x8xi32>
    %177 = arith.cmpi eq, %169, %176 : vector<8x8xi32>
    %c4_i32 = arith.constant 4 : i32
    %178 = vector.broadcast %c4_i32 : i32 to vector<8x8xi32>
    %179 = arith.cmpi eq, %169, %178 : vector<8x8xi32>
    %c5_i32 = arith.constant 5 : i32
    %180 = vector.broadcast %c5_i32 : i32 to vector<8x8xi32>
    %181 = arith.cmpi eq, %169, %180 : vector<8x8xi32>
    %c6_i32 = arith.constant 6 : i32
    %182 = vector.broadcast %c6_i32 : i32 to vector<8x8xi32>
    %183 = arith.cmpi eq, %169, %182 : vector<8x8xi32>
    %c7_i32_61 = arith.constant 7 : i32
    %184 = vector.broadcast %c7_i32_61 : i32 to vector<8x8xi32>
    %185 = arith.cmpi eq, %169, %184 : vector<8x8xi32>
    %186 = arith.cmpi sgt, %166, %165 : vector<8x8xi32>
    %187 = vector.extract_strided_slice %155 {offsets = [0, 0], sizes = [8, 64], strides = [1, 1]} : vector<8x128xbf16> to vector<8x64xbf16>
    %188 = vector.extract_strided_slice %162 {offsets = [0, 0], sizes = [8, 64], strides = [1, 1]} : vector<8x128xbf16> to vector<8x64xbf16>
    %cst_62 = arith.constant dense<0.000000e+00> : vector<8x8xf32>
    %189 = tpu.matmul %187, %188, %cst_62 {dimension_numbers = #tpu.dot_dimension_numbers<[1], [1], [0], [0], [0, 0, 1, 0], [], []>} : vector<8x64xbf16>, vector<8x64xbf16>, vector<8x8xf32> -> vector<8x8xf32>
    %190 = vector.extract_strided_slice %161 {offsets = [0, 0], sizes = [8, 64], strides = [1, 1]} : vector<8x128xbf16> to vector<8x64xbf16>
    %191 = vector.extract_strided_slice %164 {offsets = [0, 0], sizes = [8, 64], strides = [1, 1]} : vector<8x128xbf16> to vector<8x64xbf16>
    %cst_63 = arith.constant dense<0.000000e+00> : vector<8x8xf32>
    %192 = tpu.matmul %190, %191, %cst_63 {dimension_numbers = #tpu.dot_dimension_numbers<[1], [1], [0], [0], [0, 0, 1, 0], [], []>} : vector<8x64xbf16>, vector<8x64xbf16>, vector<8x8xf32> -> vector<8x8xf32>
    %cst_64 = arith.constant 0.000000e+00 : f32
    %193 = vector.broadcast %cst_64 : f32 to vector<8x8xf32>
    %194 = vector.extract_strided_slice %192 {offsets = [0, 0], sizes = [8, 1], strides = [1, 1]} : vector<8x8xf32> to vector<8x1xf32>
    %195 = vector.shape_cast %194 : vector<8x1xf32> to vector<8x1xf32>
    %196 = vector.broadcast %195 : vector<8x1xf32> to vector<8x8xf32>
    %197 = arith.select %171, %196, %193 : vector<8x8xi1>, vector<8x8xf32>
    %198 = vector.extract_strided_slice %192 {offsets = [0, 1], sizes = [8, 1], strides = [1, 1]} : vector<8x8xf32> to vector<8x1xf32>
    %199 = vector.shape_cast %198 : vector<8x1xf32> to vector<8x1xf32>
    %200 = vector.broadcast %199 : vector<8x1xf32> to vector<8x8xf32>
    %201 = arith.select %173, %200, %197 : vector<8x8xi1>, vector<8x8xf32>
    %202 = vector.extract_strided_slice %192 {offsets = [0, 2], sizes = [8, 1], strides = [1, 1]} : vector<8x8xf32> to vector<8x1xf32>
    %203 = vector.shape_cast %202 : vector<8x1xf32> to vector<8x1xf32>
    %204 = vector.broadcast %203 : vector<8x1xf32> to vector<8x8xf32>
    %205 = arith.select %175, %204, %201 : vector<8x8xi1>, vector<8x8xf32>
    %206 = vector.extract_strided_slice %192 {offsets = [0, 3], sizes = [8, 1], strides = [1, 1]} : vector<8x8xf32> to vector<8x1xf32>
    %207 = vector.shape_cast %206 : vector<8x1xf32> to vector<8x1xf32>
    %208 = vector.broadcast %207 : vector<8x1xf32> to vector<8x8xf32>
    %209 = arith.select %177, %208, %205 : vector<8x8xi1>, vector<8x8xf32>
    %210 = vector.extract_strided_slice %192 {offsets = [0, 4], sizes = [8, 1], strides = [1, 1]} : vector<8x8xf32> to vector<8x1xf32>
    %211 = vector.shape_cast %210 : vector<8x1xf32> to vector<8x1xf32>
    %212 = vector.broadcast %211 : vector<8x1xf32> to vector<8x8xf32>
    %213 = arith.select %179, %212, %209 : vector<8x8xi1>, vector<8x8xf32>
    %214 = vector.extract_strided_slice %192 {offsets = [0, 5], sizes = [8, 1], strides = [1, 1]} : vector<8x8xf32> to vector<8x1xf32>
    %215 = vector.shape_cast %214 : vector<8x1xf32> to vector<8x1xf32>
    %216 = vector.broadcast %215 : vector<8x1xf32> to vector<8x8xf32>
    %217 = arith.select %181, %216, %213 : vector<8x8xi1>, vector<8x8xf32>
    %218 = vector.extract_strided_slice %192 {offsets = [0, 6], sizes = [8, 1], strides = [1, 1]} : vector<8x8xf32> to vector<8x1xf32>
    %219 = vector.shape_cast %218 : vector<8x1xf32> to vector<8x1xf32>
    %220 = vector.broadcast %219 : vector<8x1xf32> to vector<8x8xf32>
    %221 = arith.select %183, %220, %217 : vector<8x8xi1>, vector<8x8xf32>
    %222 = vector.extract_strided_slice %192 {offsets = [0, 7], sizes = [8, 1], strides = [1, 1]} : vector<8x8xf32> to vector<8x1xf32>
    %223 = vector.shape_cast %222 : vector<8x1xf32> to vector<8x1xf32>
    %224 = vector.broadcast %223 : vector<8x1xf32> to vector<8x8xf32>
    %225 = arith.select %185, %224, %221 : vector<8x8xi1>, vector<8x8xf32>
    %226 = arith.addf %189, %225 : vector<8x8xf32>
    %cst_65 = arith.constant -1.000000e+30 : f32
    %227 = vector.broadcast %cst_65 : f32 to vector<8x8xf32>
    %228 = arith.select %186, %227, %226 : vector<8x8xi1>, vector<8x8xf32>
    %cst_66 = arith.constant dense<0xFF800000> : vector<8xf32>
    %229 = vector.multi_reduction <maximumf>, %228, %cst_66 [1] : vector<8x8xf32> to vector<8xf32>
    %230 = vector.shape_cast %229 : vector<8xf32> to vector<8x1xf32>
    %231 = vector.broadcast %230 : vector<8x1xf32> to vector<8x8xf32>
    %232 = arith.subf %228, %231 : vector<8x8xf32>
    %233 = math.exp %232 : vector<8x8xf32>
    %cst_67 = arith.constant dense<0.000000e+00> : vector<8xf32>
    %234 = vector.multi_reduction <add>, %233, %cst_67 [1] : vector<8x8xf32> to vector<8xf32>
    %235 = vector.shape_cast %234 : vector<8xf32> to vector<8x1xf32>
    %236 = vector.broadcast %235 : vector<8x1xf32> to vector<8x8xf32>
    %237 = arith.divf %233, %236 : vector<8x8xf32>
    %238 = arith.truncf %237 : vector<8x8xf32> to vector<8x8xbf16>
    %239 = vector.extract_strided_slice %163 {offsets = [0, 0], sizes = [8, 64], strides = [1, 1]} : vector<8x128xbf16> to vector<8x64xbf16>
    %cst_68 = arith.constant dense<0.000000e+00> : vector<8x64xf32>
    %240 = tpu.matmul %238, %239, %cst_68 {dimension_numbers = #tpu.dot_dimension_numbers<[1], [0], [0], [1], [0, 0, 1, 1], [], []>} : vector<8x8xbf16>, vector<8x64xbf16>, vector<8x64xf32> -> vector<8x64xf32>
    %241 = vector.extract_strided_slice %155 {offsets = [0, 64], sizes = [8, 64], strides = [1, 1]} : vector<8x128xbf16> to vector<8x64xbf16>
    %242 = vector.extract_strided_slice %162 {offsets = [0, 64], sizes = [8, 64], strides = [1, 1]} : vector<8x128xbf16> to vector<8x64xbf16>
    %cst_69 = arith.constant dense<0.000000e+00> : vector<8x8xf32>
    %243 = tpu.matmul %241, %242, %cst_69 {dimension_numbers = #tpu.dot_dimension_numbers<[1], [1], [0], [0], [0, 0, 1, 0], [], []>} : vector<8x64xbf16>, vector<8x64xbf16>, vector<8x8xf32> -> vector<8x8xf32>
    %244 = vector.extract_strided_slice %161 {offsets = [0, 64], sizes = [8, 64], strides = [1, 1]} : vector<8x128xbf16> to vector<8x64xbf16>
    %245 = vector.extract_strided_slice %164 {offsets = [0, 64], sizes = [8, 64], strides = [1, 1]} : vector<8x128xbf16> to vector<8x64xbf16>
    %cst_70 = arith.constant dense<0.000000e+00> : vector<8x8xf32>
    %246 = tpu.matmul %244, %245, %cst_70 {dimension_numbers = #tpu.dot_dimension_numbers<[1], [1], [0], [0], [0, 0, 1, 0], [], []>} : vector<8x64xbf16>, vector<8x64xbf16>, vector<8x8xf32> -> vector<8x8xf32>
    %cst_71 = arith.constant 0.000000e+00 : f32
    %247 = vector.broadcast %cst_71 : f32 to vector<8x8xf32>
    %248 = vector.extract_strided_slice %246 {offsets = [0, 0], sizes = [8, 1], strides = [1, 1]} : vector<8x8xf32> to vector<8x1xf32>
    %249 = vector.shape_cast %248 : vector<8x1xf32> to vector<8x1xf32>
    %250 = vector.broadcast %249 : vector<8x1xf32> to vector<8x8xf32>
    %251 = arith.select %171, %250, %247 : vector<8x8xi1>, vector<8x8xf32>
    %252 = vector.extract_strided_slice %246 {offsets = [0, 1], sizes = [8, 1], strides = [1, 1]} : vector<8x8xf32> to vector<8x1xf32>
    %253 = vector.shape_cast %252 : vector<8x1xf32> to vector<8x1xf32>
    %254 = vector.broadcast %253 : vector<8x1xf32> to vector<8x8xf32>
    %255 = arith.select %173, %254, %251 : vector<8x8xi1>, vector<8x8xf32>
    %256 = vector.extract_strided_slice %246 {offsets = [0, 2], sizes = [8, 1], strides = [1, 1]} : vector<8x8xf32> to vector<8x1xf32>
    %257 = vector.shape_cast %256 : vector<8x1xf32> to vector<8x1xf32>
    %258 = vector.broadcast %257 : vector<8x1xf32> to vector<8x8xf32>
    %259 = arith.select %175, %258, %255 : vector<8x8xi1>, vector<8x8xf32>
    %260 = vector.extract_strided_slice %246 {offsets = [0, 3], sizes = [8, 1], strides = [1, 1]} : vector<8x8xf32> to vector<8x1xf32>
    %261 = vector.shape_cast %260 : vector<8x1xf32> to vector<8x1xf32>
    %262 = vector.broadcast %261 : vector<8x1xf32> to vector<8x8xf32>
    %263 = arith.select %177, %262, %259 : vector<8x8xi1>, vector<8x8xf32>
    %264 = vector.extract_strided_slice %246 {offsets = [0, 4], sizes = [8, 1], strides = [1, 1]} : vector<8x8xf32> to vector<8x1xf32>
    %265 = vector.shape_cast %264 : vector<8x1xf32> to vector<8x1xf32>
    %266 = vector.broadcast %265 : vector<8x1xf32> to vector<8x8xf32>
    %267 = arith.select %179, %266, %263 : vector<8x8xi1>, vector<8x8xf32>
    %268 = vector.extract_strided_slice %246 {offsets = [0, 5], sizes = [8, 1], strides = [1, 1]} : vector<8x8xf32> to vector<8x1xf32>
    %269 = vector.shape_cast %268 : vector<8x1xf32> to vector<8x1xf32>
    %270 = vector.broadcast %269 : vector<8x1xf32> to vector<8x8xf32>
    %271 = arith.select %181, %270, %267 : vector<8x8xi1>, vector<8x8xf32>
    %272 = vector.extract_strided_slice %246 {offsets = [0, 6], sizes = [8, 1], strides = [1, 1]} : vector<8x8xf32> to vector<8x1xf32>
    %273 = vector.shape_cast %272 : vector<8x1xf32> to vector<8x1xf32>
    %274 = vector.broadcast %273 : vector<8x1xf32> to vector<8x8xf32>
    %275 = arith.select %183, %274, %271 : vector<8x8xi1>, vector<8x8xf32>
    %276 = vector.extract_strided_slice %246 {offsets = [0, 7], sizes = [8, 1], strides = [1, 1]} : vector<8x8xf32> to vector<8x1xf32>
    %277 = vector.shape_cast %276 : vector<8x1xf32> to vector<8x1xf32>
    %278 = vector.broadcast %277 : vector<8x1xf32> to vector<8x8xf32>
    %279 = arith.select %185, %278, %275 : vector<8x8xi1>, vector<8x8xf32>
    %280 = arith.addf %243, %279 : vector<8x8xf32>
    %cst_72 = arith.constant -1.000000e+30 : f32
    %281 = vector.broadcast %cst_72 : f32 to vector<8x8xf32>
    %282 = arith.select %186, %281, %280 : vector<8x8xi1>, vector<8x8xf32>
    %cst_73 = arith.constant dense<0xFF800000> : vector<8xf32>
    %283 = vector.multi_reduction <maximumf>, %282, %cst_73 [1] : vector<8x8xf32> to vector<8xf32>
    %284 = vector.shape_cast %283 : vector<8xf32> to vector<8x1xf32>
    %285 = vector.broadcast %284 : vector<8x1xf32> to vector<8x8xf32>
    %286 = arith.subf %282, %285 : vector<8x8xf32>
    %287 = math.exp %286 : vector<8x8xf32>
    %cst_74 = arith.constant dense<0.000000e+00> : vector<8xf32>
    %288 = vector.multi_reduction <add>, %287, %cst_74 [1] : vector<8x8xf32> to vector<8xf32>
    %289 = vector.shape_cast %288 : vector<8xf32> to vector<8x1xf32>
    %290 = vector.broadcast %289 : vector<8x1xf32> to vector<8x8xf32>
    %291 = arith.divf %287, %290 : vector<8x8xf32>
    %292 = arith.truncf %291 : vector<8x8xf32> to vector<8x8xbf16>
    %293 = vector.extract_strided_slice %163 {offsets = [0, 64], sizes = [8, 64], strides = [1, 1]} : vector<8x128xbf16> to vector<8x64xbf16>
    %cst_75 = arith.constant dense<0.000000e+00> : vector<8x64xf32>
    %294 = tpu.matmul %292, %293, %cst_75 {dimension_numbers = #tpu.dot_dimension_numbers<[1], [0], [0], [1], [0, 0, 1, 1], [], []>} : vector<8x8xbf16>, vector<8x64xbf16>, vector<8x64xf32> -> vector<8x64xf32>
    %295 = tpu.concatenate %240, %294 in 1 : vector<8x64xf32>, vector<8x64xf32> -> vector<8x128xf32>
    %296 = arith.truncf %295 : vector<8x128xf32> to vector<8x128xbf16>
    %c0_76 = arith.constant 0 : index
    %c0_77 = arith.constant 0 : index
    %297 = vector.load %arg8[%c0_76, %c0_77] : memref<128x128xbf16, #tpu.memory_space<vmem>>, vector<128x128xbf16>
    %cst_78 = arith.constant dense<0.000000e+00> : vector<8x128xf32>
    %298 = tpu.matmul %296, %297, %cst_78 {dimension_numbers = #tpu.dot_dimension_numbers<[1], [0], [0], [1], [0, 0, 1, 1], [], []>} : vector<8x128xbf16>, vector<128x128xbf16>, vector<8x128xf32> -> vector<8x128xf32>
    %299 = arith.addf %1, %298 : vector<8x128xf32>
    %cst_79 = arith.constant dense<0.000000e+00> : vector<8xf32>
    %300 = vector.multi_reduction <add>, %299, %cst_79 [1] : vector<8x128xf32> to vector<8xf32>
    %301 = vector.shape_cast %300 : vector<8xf32> to vector<8x1xf32>
    %cst_80 = arith.constant 1.280000e+02 : f32
    %302 = vector.broadcast %cst_80 : f32 to vector<8x1xf32>
    %303 = arith.divf %301, %302 : vector<8x1xf32>
    %304 = vector.broadcast %303 : vector<8x1xf32> to vector<8x128xf32>
    %305 = arith.subf %299, %304 : vector<8x128xf32>
    %306 = arith.mulf %305, %305 : vector<8x128xf32>
    %cst_81 = arith.constant dense<0.000000e+00> : vector<8xf32>
    %307 = vector.multi_reduction <add>, %306, %cst_81 [1] : vector<8x128xf32> to vector<8xf32>
    %308 = vector.shape_cast %307 : vector<8xf32> to vector<8x1xf32>
    %cst_82 = arith.constant 1.280000e+02 : f32
    %309 = vector.broadcast %cst_82 : f32 to vector<8x1xf32>
    %310 = arith.divf %308, %309 : vector<8x1xf32>
    %311 = vector.broadcast %303 : vector<8x1xf32> to vector<8x128xf32>
    %312 = arith.subf %299, %311 : vector<8x128xf32>
    %cst_83 = arith.constant 9.99999974E-6 : f32
    %313 = vector.broadcast %cst_83 : f32 to vector<8x1xf32>
    %314 = arith.addf %310, %313 : vector<8x1xf32>
    %315 = math.rsqrt %314 : vector<8x1xf32>
    %316 = vector.broadcast %315 : vector<8x1xf32> to vector<8x128xf32>
    %317 = arith.mulf %312, %316 : vector<8x128xf32>
    %c0_84 = arith.constant 0 : index
    %c0_85 = arith.constant 0 : index
    %318 = vector.load %arg9[%c0_84, %c0_85] : memref<2x128xf32, #tpu.memory_space<vmem>>, vector<1x128xf32>
    %319 = vector.broadcast %318 : vector<1x128xf32> to vector<8x128xf32>
    %320 = arith.mulf %317, %319 : vector<8x128xf32>
    %c1_86 = arith.constant 1 : index
    %c0_87 = arith.constant 0 : index
    %321 = vector.load %arg9[%c1_86, %c0_87] : memref<2x128xf32, #tpu.memory_space<vmem>>, vector<1x128xf32>
    %322 = vector.broadcast %321 : vector<1x128xf32> to vector<8x128xf32>
    %323 = arith.addf %320, %322 : vector<8x128xf32>
    %c0_88 = arith.constant 0 : index
    %c0_89 = arith.constant 0 : index
    %c0_90 = arith.constant 0 : index
    %324 = vector.load %arg10[%c0_88, %c0_89, %c0_90] : memref<1x8x128xf32, #tpu.memory_space<vmem>>, vector<1x8x128xf32>
    %325 = vector.shape_cast %324 : vector<1x8x128xf32> to vector<8x128xf32>
    %326 = vector.shape_cast %323 : vector<8x128xf32> to vector<1x8x128xf32>
    tpu.vector_store %arg10[%c0_88, %c0_89, %c0_90], %326 {strides = array<i32>} : memref<1x8x128xf32, #tpu.memory_space<vmem>>, vector<1x8x128xf32>,
    return
  }
  func.func @transform_0(%arg0: i32) -> (i32, i32, i32) {
    %c0_i32 = arith.constant 0 : i32
    %c0_i32_0 = arith.constant 0 : i32
    %c0_i32_1 = arith.constant 0 : i32
    return %arg0, %c0_i32, %c0_i32_0 : i32, i32, i32
  }
  func.func @transform_1(%arg0: i32) -> (i32, i32) {
    %c0_i32 = arith.constant 0 : i32
    %c0_i32_0 = arith.constant 0 : i32
    %c0_i32_1 = arith.constant 0 : i32
    return %c0_i32, %c0_i32_0 : i32, i32
  }
  func.func @transform_2(%arg0: i32) -> (i32, i32) {
    %c0_i32 = arith.constant 0 : i32
    %c0_i32_0 = arith.constant 0 : i32
    %c0_i32_1 = arith.constant 0 : i32
    return %c0_i32, %c0_i32_0 : i32, i32
  }
  func.func @transform_3(%arg0: i32) -> (i32, i32) {
    %c0_i32 = arith.constant 0 : i32
    %c0_i32_0 = arith.constant 0 : i32
    %c0_i32_1 = arith.constant 0 : i32
    return %c0_i32, %c0_i32_0 : i32, i32
  }
  func.func @transform_4(%arg0: i32) -> (i32, i32, i32) {
    %c0_i32 = arith.constant 0 : i32
    %c0_i32_0 = arith.constant 0 : i32
    %c0_i32_1 = arith.constant 0 : i32
    %c0_i32_2 = arith.constant 0 : i32
    return %c0_i32, %c0_i32_0, %c0_i32_1 : i32, i32, i32
  }
  func.func @transform_5(%arg0: i32) -> (i32, i32) {
    %c0_i32 = arith.constant 0 : i32
    %c0_i32_0 = arith.constant 0 : i32
    %c0_i32_1 = arith.constant 0 : i32
    return %c0_i32, %c0_i32_0 : i32, i32
  }
  func.func @transform_6(%arg0: i32) -> (i32, i32) {
    %c0_i32 = arith.constant 0 : i32
    %c0_i32_0 = arith.constant 0 : i32
    %c0_i32_1 = arith.constant 0 : i32
    return %c0_i32, %c0_i32_0 : i32, i32
  }
  func.func @transform_7(%arg0: i32) -> (i32, i32) {
    %c0_i32 = arith.constant 0 : i32
    %c0_i32_0 = arith.constant 0 : i32
    %c0_i32_1 = arith.constant 0 : i32
    return %c0_i32, %c0_i32_0 : i32, i32
  }
  func.func @transform_8(%arg0: i32) -> (i32, i32) {
    %c0_i32 = arith.constant 0 : i32
    %c0_i32_0 = arith.constant 0 : i32
    %c0_i32_1 = arith.constant 0 : i32
    return %c0_i32, %c0_i32_0 : i32, i32
  }
  func.func @transform_9(%arg0: i32) -> (i32, i32, i32) {
    %c0_i32 = arith.constant 0 : i32
    %c0_i32_0 = arith.constant 0 : i32
    %c0_i32_1 = arith.constant 0 : i32
    return %arg0, %c0_i32, %c0_i32_0 : i32, i32, i32
  }
}

</mosaic_0001>

<bundles_post_ra>
// kernel: decoder_layer_forward.1
= control target key start
LH: loop header
LB: loop body
LE: loop exit
PB: predicated region body
PF: predicated region fallthrough
CT: control target
= control target key end

     0   :  { %s3518_s30 = smov 0   ;;  %s4687_s0 = inlined_call_operand.vmem [shape: f32[2,8,128], index: 0, kind: input, shape index: {}]   ;;  %s4688_s1 = inlined_call_operand.vmem [shape: bf16[128,384], index: 1, kind: input, shape index: {}]   ;;  %s4689_s2 = inlined_call_operand.vmem [shape: f32[8,128], index: 2, kind: input, shape index: {}]   ;;  %s4690_s3 = inlined_call_operand.vmem [shape: bf16[128,128], index: 3, kind: input, shape index: {}]   ;;  %s4691_s4 = inlined_call_operand.vmem [shape: bf16[3,448,64], index: 4, kind: input, shape index: {}]   ;;  %s4692_s5 = inlined_call_operand.vmem [shape: f32[3,128], index: 5, kind: input, shape index: {}]   ;;  %s4693_s6 = inlined_call_operand.vmem [shape: f32[2,128], index: 6, kind: input, shape index: {}]   ;;  %s4694_s7 = inlined_call_operand.vmem [shape: bf16[128,128], index: 7, kind: input, shape index: {}]   ;;  %s4695_s8 = inlined_call_operand.vmem [shape: f32[2,128], index: 8, kind: input, shape index: {}]   ;;  %s4696_s9 = inlined_call_operand.vmem [shape: f32[2,8,128], index: 9, kind: output, shape index: {}]  }
   0x1 LB: > { %s2694_s10 = sadd.s32 4294967295, %s3455_s30   ;;  %p2698_p0 = scmp.ge.s32.totalorder %s3455_s30, 1  ;;  %s3455_s30 = sphi %s3518_s30, %s19_s30  }
   0x2   : > { %p286_p1 = scmp.lt.s32.totalorder %s3455_s30, 3 }
   0x4   : > { %p287_p2 = pnand %p2698_p0, %p286_p1 }
   0x5   : > { %p320_p3 = scmp.lt.s32.totalorder (!%p287_p2), %s2694_s10, 1  ;;  %s3460_s16 = smov (!%p287_p2), 64  }
   0x6   : > { %290 = sbr.rel (%p287_p2) target bundleno = 2895 (0xb4f), region = 56 }
   0xb   : > { %v3306_v0 = vld [vmem:[%s4688_s1 + $0xac] ss:$12 sps:$4 sm:$0xff]   ;;  %v3308_v1 = vld [vmem:[%s4688_s1 + $0xa8] ss:$12 sps:$4 sm:$0xff]   ;;  %v3457_v2 = vmov 0   ;;  %v3458_v4 = vmov 0.0  }
   0xc   : > { %523 = vmatprep.mubr.bf16.mxu0 %v3457_v2  ;;  %3289 = vset.pattern.permute.xlu0 %v3457_v2  ;;  %v3309_v3 = vld [vmem:[%s4688_s1 + $0x94] ss:$12 sps:$4 sm:$0xff]   ;;  %v3311_v5 = vld [vmem:[%s4688_s1 + $0x90] ss:$12 sps:$4 sm:$0xff]   ;;  %vm3459_vm0 = vmmov 0   ;;  %s4698_s10 = smov (!%p320_p3, %s2694_s10), 1 }
   0xd   : > { %491 = vmatprep.subr.bf16.mxu0 %v3306_v0  ;;  %3129 = vmatprep.subr.bf16.mxu1 %v3458_v4  ;;  %v3312_v6 = vld [vmem:[%s4688_s1 + $0x7c] ss:$12 sps:$4 sm:$0xff]   ;;  %v3314_v7 = vld [vmem:[%s4688_s1 + $0x78] ss:$12 sps:$4 sm:$0xff]   ;;  %v3317_v9 = vld [vmem:[%s4688_s1 + $0x60] ss:$12 sps:$4 sm:$0xff]  }
   0xe   : > { %492 = vmatpush1.bf16.msra.mxu0 %v3308_v1  ;;  %3145 = vmatprep.mubr.msk.bf16.mxu1 %vm3459_vm0, %v3458_v4  ;;  %v3315_v8 = vld [vmem:[%s4688_s1 + $0x64] ss:$12 sps:$4 sm:$0xff]   ;;  %v3318_v11 = vld [vmem:[%s4688_s1 + $0x4c] ss:$12 sps:$4 sm:$0xff]   ;;  %v3320_v13 = vld [vmem:[%s4688_s1 + $0x48] ss:$12 sps:$4 sm:$0xff]  }
   0xf   : > { %493 = vmatprep.subr.bf16.mxu0 %v3309_v3  ;;  %v3330_v10 = vld [vmem:[%s4688_s1 + $0xb0] ss:$12 sps:$4 sm:$0xff]   ;;  %v3331_v12 = vld [vmem:[%s4688_s1 + $0x98] ss:$12 sps:$4 sm:$0xff]   ;;  %v3321_v14 = vld [vmem:[%s4688_s1 + $0x34] ss:$12 sps:$4 sm:$0xff]  }
  0x10   : > { %3130 = vmatpush3.bf16.msra.mxu1 %v3330_v10  ;;  %v3332_v15 = vld [vmem:[%s4688_s1 + $0x80] ss:$12 sps:$4 sm:$0xff]   ;;  %s2699_s20 = sshll.u32 %s4698_s10, 3  ;;  %v3323_v16 = vld [vmem:[%s4688_s1 + $0x30] ss:$12 sps:$4 sm:$0xff]   ;;  %vm701_vm1 = vcmask 1044480  }
  0x11   : > { %3131 = vmatprep.subr.bf16.mxu1 %v3458_v4  ;;  %v3324_v17 = vld [vmem:[%s4688_s1 + $0x1c] ss:$12 sps:$4 sm:$0xff]   ;;  %s3596_s29 = scalar_lea.vmem %s4687_s0, %s2699_s20  ;;  %v3326_v19 = vld [vmem:[%s4688_s1 + $0x18] ss:$12 sps:$4 sm:$0xff]   ;;  %v3329_v21 = vld [vmem:[%s4688_s1] ss:$12 sps:$4 sm:$0xff]   ;;  %s327_s12 = scalar_lea.vmem %s4696_s9, %s2699_s20 }
  0x12   : > { %494 = vmatpush1.bf16.msra.mxu0 %v3311_v5  ;;  %v3333_v18 = vld [vmem:[%s4688_s1 + $0x68] ss:$12 sps:$4 sm:$0xff]   ;;  %v3327_v20 = vld [vmem:[%s4688_s1 + $0x4] ss:$12 sps:$4 sm:$0xff]   ;;  %v3338_v25 = vld [vmem:[%s4690_s3 + $0x38] sm:$0xff]   ;;  %vm693_vm2 = vcmask 1046528  }
  0x13   : > { %495 = vmatprep.subr.bf16.mxu0 %v3312_v6  ;;  %v329_v22 = vld [vmem:[%s3596_s29] sm:$0xff]  ;;  %v3334_v23 = vld [vmem:[%s4688_s1 + $0x50] ss:$12 sps:$4 sm:$0xff]   ;;  %v3337_v29 = vld [vmem:[%s4688_s1 + $0x8] ss:$12 sps:$4 sm:$0xff]   ;;  %vm685_vm3 = vcmask 1041408  }
  0x14   : > { %3132 = vmatpush3.bf16.msra.mxu1 %v3331_v12  ;;  %v3335_v24 = vld [vmem:[%s4688_s1 + $0x38] ss:$12 sps:$4 sm:$0xff]   ;;  %v330_v26 = vpack.c.bf16 %v329_v22, %v329_v22  ;;  %v3336_v27 = vld [vmem:[%s4688_s1 + $0x20] ss:$12 sps:$4 sm:$0xff]   ;;  %v3339_v28 = vld [vmem:[%s4690_s3 + $0x30] sm:$0xff]   ;;  %vm681_vm4 = vcmask 1042432  }
  0x15   : > { %3133 = vmatprep.subr.bf16.mxu1 %v3458_v4  ;;  %v3340_v30 = vld [vmem:[%s4690_s3 + $0x28] sm:$0xff]   ;;  %v3341_v31 = vld [vmem:[%s4690_s3 + $0x20] sm:$0xff]   ;;  %v3342_v32 = vld [vmem:[%s4690_s3 + $0x18] sm:$0xff]   ;;  %vm689_vm5 = vcmask 1040384   ;;  %vm714_vm6 = vcmask 523264   ;;  %vm697_vm7 = vcmask 1045504  }
  0x16   : > { %496 = vmatpush1.bf16.msra.mxu0 %v3314_v7  ;;  %v3343_v33 = vld [vmem:[%s4690_s3 + $0x10] sm:$0xff]   ;;  %v3344_v34 = vld [vmem:[%s4690_s3 + $0x8] sm:$0xff]   ;;  %v3345_v35 = vld [vmem:[%s4690_s3] sm:$0xff]  }
  0x17   : > { %497 = vmatprep.subr.bf16.mxu0 %v3315_v8  ;;  %v572_v36 = vld [vmem:[%s4689_s2] sm:$0xff]  ;;  %v3666_v38 = vld [vmem:[%s4691_s4 + $0xb8] sm:$0xff]   ;;  %v3682_v41 = vld [vmem:[%s4691_s4 + $0xb0] sm:$0xff]  }
  0x18   : > { %3134 = vmatpush3.bf16.msra.mxu1 %v3332_v15  ;;  %v573_v37 = vpack.c.bf16 %v572_v36, %v572_v36  ;;  %v3671_v39 = vld [vmem:[%s4691_s4 + $0x78] sm:$0xff]   ;;  %v3687_v42 = vld [vmem:[%s4691_s4 + $0x70] sm:$0xff]   ;;  %v3701_v44 = vld [vmem:[%s4691_s4 + $0x68] sm:$0xff]  }
  0x19   : > { %3135 = vmatprep.subr.bf16.mxu1 %v3458_v4  ;;  %v3676_v40 = vld [vmem:[%s4691_s4 + $0x38] sm:$0xff]   ;;  %v3695_v43 = vld [vmem:[%s4691_s4 + $0x30] sm:$0xff]   ;;  %v3707_v45 = vld [vmem:[%s4691_s4 + $0xa8] sm:$0xff]  }
  0x1a   : > { %498 = vmatpush1.bf16.msra.mxu0 %v3317_v9  ;;  %v3714_v46 = vld [vmem:[%s4691_s4 + $0x28] sm:$0xff]   ;;  %v3720_v47 = vld [vmem:[%s4691_s4 + $0x60] sm:$0xff]   ;;  %v3739_v50 = vld [vmem:[%s4691_s4 + $0x58] sm:$0xff]  }
  0x1b   : > { %499 = vmatprep.subr.bf16.mxu0 %v3318_v11  ;;  %v3726_v48 = vld [vmem:[%s4691_s4 + $0xa0] sm:$0xff]   ;;  %v3745_v51 = vld [vmem:[%s4691_s4 + $0x98] sm:$0xff]   ;;  %v3758_v53 = vld [vmem:[%s4691_s4 + $0x50] sm:$0xff]  }
  0x1c   : > { %3136 = vmatpush3.bf16.msra.mxu1 %v3333_v18  ;;  %v3733_v49 = vld [vmem:[%s4691_s4 + $0x20] sm:$0xff]   ;;  %v3752_v52 = vld [vmem:[%s4691_s4 + $0x18] sm:$0xff]   ;;  %v3764_v54 = vld [vmem:[%s4691_s4 + $0x90] sm:$0xff]  }
  0x1d   : > { %3137 = vmatprep.subr.bf16.mxu1 %v3458_v4  ;;  %v3771_v55 = vld [vmem:[%s4691_s4 + $0x10] sm:$0xff]   ;;  %v3777_v56 = vld [vmem:[%s4691_s4 + $0x48] sm:$0xff]   ;;  %v3797_v59 = vld [vmem:[%s4691_s4 + $0x80] sm:$0xff]  }
  0x1e   : > { %500 = vmatpush1.bf16.msra.mxu0 %v3320_v13  ;;  %v3783_v57 = vld [vmem:[%s4691_s4 + $0x88] sm:$0xff]   ;;  %v3805_v60 = vld [vmem:[%s4691_s4 + $0xd8] sm:$0xff]   ;;  %v3812_v61 = vld [vmem:[%s4691_s4 + $0xd0] sm:$0xff]  }
  0x1f   : > { %501 = vmatprep.subr.bf16.mxu0 %v3321_v14  ;;  %v3790_v58 = vld [vmem:[%s4691_s4 + $0x8] sm:$0xff]   ;;  %v3820_v62 = vld [vmem:[%s4691_s4 + $0x40] sm:$0xff]  }
  0x20   : > { %3138 = vmatpush3.bf16.msra.mxu1 %v3334_v23  ;;  %v3825_v63 = vld [vmem:[%s4691_s4] sm:$0xff]   ;;  %v3830_v0 = vld [vmem:[%s4691_s4 + $0xc8] sm:$0xff]  }
  0x21   : > { %3139 = vmatprep.subr.bf16.mxu1 %v3458_v4  ;;  %v3845_v7 = vld [vmem:[%s4691_s4 + $0xc0] sm:$0xff]  }
  0x22   : > { %502 = vmatpush1.bf16.msra.mxu0 %v3323_v16 }
  0x23   : > { %503 = vmatprep.subr.bf16.mxu0 %v3324_v17 }
  0x24   : > { %3140 = vmatpush3.bf16.msra.mxu1 %v3335_v24 }
  0x25   : > { %3141 = vmatprep.subr.bf16.mxu1 %v3458_v4 }
  0x26   : > { %504 = vmatpush1.bf16.msra.mxu0 %v3326_v19 }
  0x27   : > { %505 = vmatprep.subr.bf16.mxu0 %v3327_v20  ;;  %v3867_v20 = vld [vmem:[%s4691_s4 + $0x158] sm:$0xff]  }
  0x28   : > { %3142 = vmatpush3.bf16.msra.mxu1 %v3336_v27 }
  0x29   : > { %3143 = vmatprep.subr.bf16.mxu1 %v3458_v4 }
  0x2a   : > { %506 = vmatpush1.bf16.msra.mxu0 %v3329_v21 }
  0x2b   : > { %3149 = vmatprep.subr.bf16.mxu0 %v3458_v4 }
  0x2c   : > { %3144 = vmatpush3.bf16.msra.mxu1 %v3337_v29 }
  0x2d   : > { %524 = vmatmul.mubr.bf16.vlgmr.msra.gmra.mxu0 %v330_v26  ;;  %2976 = vmatprep.subr.bf16.mxu1 %v3671_v39 }
  0x2e   : > { %3150 = vmatpush3.bf16.msra.mxu0 %v3338_v25  ;;  %3165 = vmatprep.mubr.msk.bf16.mxu0 %vm3459_vm0, %v3458_v4 }
  0x2f   : > { %3151 = vmatprep.subr.bf16.mxu0 %v3458_v4  ;;  %3146 = vmatmul.mubr.bf16.vlgmr.msra.gmra.mxu1 %v330_v26 }
  0x30   : > { %2977 = vmatpush3.bf16.msra.mxu1 %v3676_v40 }
  0x31   : > { %2978 = vmatprep.subr.bf16.mxu1 %v3687_v42 }
  0x32   : > { %3152 = vmatpush3.bf16.msra.mxu0 %v3339_v28 }
  0x33   : > { %3153 = vmatprep.subr.bf16.mxu0 %v3458_v4 }
  0x34   : > { %2979 = vmatpush3.bf16.msra.mxu1 %v3695_v43 }
  0x35   : > { %2980 = vmatprep.subr.bf16.mxu1 %v3701_v44 }
  0x36   : > { %3154 = vmatpush3.bf16.msra.mxu0 %v3340_v30 }
  0x37   : > { %3155 = vmatprep.subr.bf16.mxu0 %v3458_v4 }
  0x38   : > { %2981 = vmatpush3.bf16.msra.mxu1 %v3714_v46 }
  0x39   : > { %2982 = vmatprep.subr.bf16.mxu1 %v3720_v47 }
  0x3a   : > { %3156 = vmatpush3.bf16.msra.mxu0 %v3341_v31 }
  0x3b   : > { %3157 = vmatprep.subr.bf16.mxu0 %v3458_v4 }
  0x3c   : > { %2983 = vmatpush3.bf16.msra.mxu1 %v3733_v49 }
  0x3d   : > { %2984 = vmatprep.subr.bf16.mxu1 %v3739_v50 }
  0x3e   : > { %3158 = vmatpush3.bf16.msra.mxu0 %v3342_v32 }
  0x3f   : > { %3159 = vmatprep.subr.bf16.mxu0 %v3458_v4 }
  0x40   : > { %2985 = vmatpush3.bf16.msra.mxu1 %v3752_v52 }
  0x41   : > { %2986 = vmatprep.subr.bf16.mxu1 %v3758_v53 }
  0x42   : > { %3160 = vmatpush3.bf16.msra.mxu0 %v3343_v33 }
  0x43   : > { %3161 = vmatprep.subr.bf16.mxu0 %v3458_v4 }
  0x44   : > { %2987 = vmatpush3.bf16.msra.mxu1 %v3771_v55 }
  0x45   : > { %2988 = vmatprep.subr.bf16.mxu1 %v3777_v56 }
  0x46   : > { %3162 = vmatpush3.bf16.msra.mxu0 %v3344_v34 }
  0x47   : > { %3163 = vmatprep.subr.bf16.mxu0 %v3458_v4 }
  0x48   : > { %2989 = vmatpush3.bf16.msra.mxu1 %v3790_v58 }
  0x49   : > { %2990 = vmatprep.subr.bf16.mxu1 %v3820_v62 }
  0x4a   : > { %3164 = vmatpush3.bf16.msra.mxu0 %v3345_v35 }
  0x4b   : > { %989 = vmatprep.subr.bf16.mxu0 %v3457_v2 }
  0x4c   : > { %2991 = vmatpush3.bf16.msra.mxu1 %v3825_v63 }
  0x4d   : > { %3166 = vmatmul.mubr.bf16.vlgmr.msra.gmra.mxu0 %v573_v37  ;;  %2998 = vmatprep.subr.bf16.mxu1 %v3671_v39 }
  0x4e   : > { %990 = vmatpush1.bf16.msra.mxu0 %v3666_v38 }
  0x4f   : > { %991 = vmatprep.subr.bf16.mxu0 %v3457_v2 }
  0x52   : > { %992 = vmatpush1.bf16.msra.mxu0 %v3682_v41 }
  0x53   : > { %993 = vmatprep.subr.bf16.mxu0 %v3457_v2 }
  0x56   : > { %994 = vmatpush1.bf16.msra.mxu0 %v3707_v45 }
  0x57   : > { %995 = vmatprep.subr.bf16.mxu0 %v3457_v2 }
  0x5a   : > { %996 = vmatpush1.bf16.msra.mxu0 %v3726_v48 }
  0x5b   : > { %997 = vmatprep.subr.bf16.mxu0 %v3457_v2 }
  0x5e   : > { %998 = vmatpush1.bf16.msra.mxu0 %v3745_v51 }
  0x5f   : > { %999 = vmatprep.subr.bf16.mxu0 %v3457_v2 }
  0x62   : > { %1000 = vmatpush1.bf16.msra.mxu0 %v3764_v54 }
  0x63   : > { %1001 = vmatprep.subr.bf16.mxu0 %v3457_v2 }
  0x66   : > { %1002 = vmatpush1.bf16.msra.mxu0 %v3783_v57 }
  0x67   : > { %1003 = vmatprep.subr.bf16.mxu0 %v3457_v2 }
  0x6a   : > { %1004 = vmatpush1.bf16.msra.mxu0 %v3797_v59 }
  0x6b   : > { %1013 = vmatprep.subr.bf16.mxu0 %v3457_v2 }
  0x6e   : > { %1014 = vmatpush2.bf16.msra.mxu0 %v3805_v60 }
  0x6f   : > { %1015 = vmatprep.subr.bf16.mxu0 %v3457_v2 }
  0x72   : > { %1016 = vmatpush2.bf16.msra.mxu0 %v3812_v61 }
  0x73   : > { %1017 = vmatprep.subr.bf16.mxu0 %v3457_v2 }
  0x76   : > { %1018 = vmatpush2.bf16.msra.mxu0 %v3830_v0 }
  0x77   : > { %1019 = vmatprep.subr.bf16.mxu0 %v3457_v2 }
  0x7a   : > { %1020 = vmatpush2.bf16.msra.mxu0 %v3845_v7 }
  0x7b   : > { %3020 = vmatprep.subr.bf16.mxu0 %v3867_v20 }
  0xed   : > { %v3835_v1 = vpop.f32.mrf.mxu0 }
  0xee   : > { %v699_v3 = vrot.slane %v3835_v1, 3  ;;  %v691_v5 = vrot.slane %v3835_v1, 1  ;;  %v683_v6 = vrot.slane %v3835_v1, 6  ;;  %v679_v9 = vrot.slane %v3835_v1, 5 }
  0xef   : > { %v3847_v8 = vpop.f32.mrf.mxu0  ;;  %v687_v10 = vrot.slane %v3835_v1, 7  ;;  %v695_v32 = vrot.slane %v3835_v1, 2 }
  0xf0   : > { %v702_v11 = vsel %vm701_vm1, %v699_v3, 0.0  ;;  %v3853_v12 = vsel %vm693_vm2, %v691_v5, 0.0  ;;  %v3856_v13 = vsel %vm685_vm3, 0.0, %v683_v6  ;;  %v1147_v18 = vrot.slane %v3847_v8, 5  ;;  %v3915_v5 = vpop.f32.mrf.mxu1 }
  0xf1   : > { %v529_v14 = vpop.f32.mrf.mxu0  ;;  %v721_v15 = vpack.c.bf16 %v702_v11, %v702_v11  ;;  %v3254_v16 = vpack.i.bf16 %v702_v11, %v3853_v12  ;;  %v3244_v17 = vpack.i.bf16 %v3856_v13, %v3835_v1  ;;  %v1153_v19 = vrot.slane %v3847_v8, 7 }
  0xf2   : > { %v682_v22 = vsel %vm681_vm4, 0.0, %v679_v9  ;;  %v690_v23 = vsel %vm689_vm5, 0.0, %v687_v10  ;;  %v1156_v24 = vrot.slane %v3847_v8, 1  ;;  %v1162_v25 = vrot.slane %v3847_v8, 3  ;;  %v3147_v6 = vpop.f32.mrf.mxu1 }
  0xf3   : > { %2761 = vmatprep.mubr.msk.bf16.mxu0 %vm714_vm6, %v721_v15  ;;  %3255 = vrot.lane.b32.xlu1 %v3254_v16, %s3460_s16  ;;  %v530_v21 = vpop.f32.mrf.mxu0  ;;  %v3877_v26 = vsel %vm681_vm4, 0.0, %v1147_v18  ;;  %v3880_v27 = vsel %vm689_vm5, 0.0, %v1153_v19  ;;  %v3249_v29 = vpack.i.bf16 %v682_v22, %v690_v23  ;;  %v1150_v33 = vrot.slane %v3847_v8, 6 }
  0xf4   : > { %3245 = vrot.lane.b32.xlu0 %v3244_v17, %s3460_s16  ;;  %v3259_v28 = vpack.i.bf16 %v3877_v26, %v3880_v27  ;;  %v3886_v30 = vsel %vm693_vm2, %v1156_v24, 0.0  ;;  %v3889_v31 = vsel %vm701_vm1, %v1162_v25, 0.0  ;;  %v1159_v35 = vrot.slane %v3847_v8, 2  ;;  %v569_v11 = vpop.f32.mrf.mxu1 }
  0xf5   : > { %v3264_v34 = vpack.i.bf16 %v3889_v31, %v3886_v30  ;;  %v3899_v36 = vsel %vm697_vm7, %v695_v32, 0.0  ;;  %v3903_v37 = vsel %vm685_vm3, 0.0, %v1150_v33  ;;  %v1609_v9 = vrot.slane %v3915_v5, 5 }
  0xf6   : > { %v3269_v39 = vpack.i.bf16 %v3903_v37, %v3847_v8  ;;  %v3910_v3 = vsel %vm697_vm7, %v1159_v35, 0.0  ;;  %v1615_v10 = vrot.slane %v3915_v5, 7  ;;  %v3148_v16 = vpop.f32.mrf.mxu1  ;;  %v1618_v18 = vrot.slane %v3915_v5, 1 }
  0xf7   : > { %3260 = vrot.lane.b32.xlu1 %v3259_v28, %s3460_s16  ;;  %v3920_v14 = vsel %vm681_vm4, 0.0, %v1609_v9  ;;  %v1624_v19 = vrot.slane %v3915_v5, 3 }
  0xf8   : > { %3250 = vrot.lane.b32.xlu0 %v3249_v29, %s3460_s16  ;;  %v3923_v15 = vsel %vm689_vm5, 0.0, %v1615_v10  ;;  %v3931_v21 = vsel %vm693_vm2, %v1618_v18, 0.0  ;;  %v3969_v18 = vld [vmem:[%s4691_s4 + $0x148] sm:$0xff]   ;;  %vm2238_vm2 = vcmask 64512  }
  0xf9   : > { %v3274_v17 = vpack.i.bf16 %v3920_v14, %v3923_v15  ;;  %v3934_v24 = vsel %vm701_vm1, %v1624_v19, 0.0 }
  0xfa   : > { %v3279_v25 = vpack.i.bf16 %v3934_v24, %v3931_v21 }
  0xfb   : > { %3265 = vrot.lane.b32.xlu1 %v3264_v34, %s3460_s16 }
  0xfc   : > { %711 = vrot.lane.b32.xlu0 %v3899_v36, %s3460_s16 }
  0xff   : > { %1173 = vrot.lane.b32.xlu1 %v3910_v3, %s3460_s16 }
 0x100   : > { %3270 = vrot.lane.b32.xlu0 %v3269_v39, %s3460_s16 }
 0x103   : > { %3280 = vrot.lane.b32.xlu1 %v3279_v25, %s3460_s16  ;;  %v3985_v25 = vld [vmem:[%s4691_s4 + $0x140] sm:$0xff]  }
 0x104   : > { %3275 = vrot.lane.b32.xlu0 %v3274_v17, %s3460_s16 }
 0x166   : > { %v3246_v28 = vpop.permute.xlu0 %3245 }
 0x167   : > { %v3248_v29 = vunpack.i.h.bf16 %v3246_v28  ;;  %v3247_v32 = vunpack.i.l.bf16 %v3246_v28  ;;  %v4029_v28 = vpop.permute.xlu1 %3255 }
 0x169   : > { %v715_v33 = vsel %vm714_vm6, %v682_v22, %v3248_v29  ;;  %v716_v34 = vsel %vm714_vm6, %v690_v23, %v3247_v32  ;;  %v3950_v22 = vld [vmem:[%s4691_s4 + $0x118] sm:$0xff]  }
 0x16a   : > { %v718_v35 = vpack.c.bf16 %v715_v33, %v715_v33  ;;  %v3251_v39 = vpop.permute.xlu0 %3250  ;;  %v719_v6 = vpack.c.bf16 %v716_v34, %v716_v34  ;;  %v4054_v33 = vld [vmem:[%s4691_s4 + $0xe0] sm:$0xff]  }
 0x16b   : > { %v3252_v9 = vunpack.i.l.bf16 %v3251_v39 }
 0x16c   : > { %981 = vmatprep.mubr.bf16.mxu1 %v719_v6  ;;  %v4137_v6 = vpop.permute.xlu1 %3260 }
 0x16d   : > { %982 = vmatmul.mubr.bf16.vlgmr.msra.gmra.mxu1 %v718_v35  ;;  %v1046_v10 = vsel %vm714_vm6, %v3252_v9, %v3835_v1  ;;  %v3955_v1 = vld [vmem:[%s4691_s4 + $0x150] sm:$0xff]  }
 0x16e   : > { %2999 = vmatpush3.bf16.msra.mxu1 %v3676_v40  ;;  %v712_v11 = vpop.permute.xlu0 %711  ;;  %v1049_v16 = vpack.c.bf16 %v1046_v10, %v1046_v10 }
 0x16f   : > { %v717_v17 = vsel %vm714_vm6, %v3853_v12, %v712_v11  ;;  %3000 = vmatprep.subr.bf16.mxu1 %v3687_v42  ;;  %v3963_v42 = vld [vmem:[%s4691_s4 + $0x110] sm:$0xff]   ;;  %v3257_v11 = vunpack.i.l.bf16 %v4029_v28 }
 0x170   : > { %v720_v23 = vpack.c.bf16 %v717_v17, %v717_v17  ;;  %1087 = vmatprep.mubr.bf16.mxu1 %v1049_v16  ;;  %v4157_v16 = vpop.permute.xlu1 %3265  ;;  %v3262_v17 = vunpack.i.l.bf16 %v4137_v6 }
 0x172   : > { %3001 = vmatpush3.bf16.msra.mxu1 %v3695_v43  ;;  %1022 = vmatmul.mubr.bf16.vlgmr.msra.gmra.mxu0 %v720_v23  ;;  %v3271_v40 = vpop.permute.xlu0 %3270  ;;  %v1047_v23 = vsel %vm714_vm6, %v3257_v11, %v3899_v36 }
 0x173   : > { %3021 = vmatpush3.bf16.msra.mxu0 %v3950_v22  ;;  %v3272_v12 = vunpack.i.l.bf16 %v3271_v40  ;;  %3002 = vmatprep.subr.bf16.mxu1 %v3701_v44  ;;  %v3979_v44 = vld [vmem:[%s4691_s4 + $0x108] sm:$0xff]   ;;  %v3273_v32 = vunpack.i.h.bf16 %v3271_v40  ;;  %v1508_v40 = vsel %vm714_vm6, %v3262_v17, %v3847_v8 }
 0x174   : > { %3022 = vmatprep.subr.bf16.mxu0 %v3955_v1  ;;  %v1511_v36 = vpack.c.bf16 %v1508_v40, %v1508_v40 }
 0x175   : > { %v1177_v43 = vsel %vm714_vm6, %v3880_v27, %v3272_v12  ;;  %v4027_v27 = vld [vmem:[%s4691_s4 + $0x128] sm:$0xff]   ;;  %v1176_v34 = vsel %vm714_vm6, %v3877_v26, %v3273_v32  ;;  %v1182_v26 = vpack.c.bf16 %v3889_v31, %v3889_v31  ;;  %v4127_v31 = vpop.f32.mrf.mxu0  ;;  %v1174_v12 = vpop.permute.xlu1 %1173 }
 0x176   : > { %3003 = vmatpush3.bf16.msra.mxu1 %v3714_v46  ;;  %v1180_v19 = vpack.c.bf16 %v1177_v43, %v1177_v43  ;;  %v3993_v46 = vld [vmem:[%s4691_s4 + $0x100] sm:$0xff]   ;;  %v1179_v35 = vpack.c.bf16 %v1176_v34, %v1176_v34 }
 0x177   : > { %3023 = vmatpush3.bf16.msra.mxu0 %v3963_v42  ;;  %3004 = vmatprep.subr.bf16.mxu1 %v3720_v47  ;;  %v3999_v47 = vld [vmem:[%s4691_s4 + $0x138] sm:$0xff]   ;;  %v4180_v43 = vld [vmem:[%s4691_s4 + $0x1a0] sm:$0xff]  }
 0x178   : > { %1443 = vmatprep.mubr.bf16.mxu0 %v1180_v19  ;;  %3024 = vmatprep.subr.bf16.mxu0 %v3969_v18  ;;  %v1178_v19 = vsel %vm714_vm6, %v3886_v30, %v1174_v12  ;;  %v4203_v30 = vld [vmem:[%s4691_s4 + $0x230] sm:$0xff]   ;;  %v4379_v12 = vld [vmem:[%s4691_s4 + $0x258] sm:$0xff]  }
 0x179   : > { %v1181_v8 = vpack.c.bf16 %v1178_v19, %v1178_v19  ;;  %v4407_v19 = vld [vmem:[%s4691_s4 + $0x298] sm:$0xff]  }
 0x17a   : > { %3005 = vmatpush3.bf16.msra.mxu1 %v3733_v49  ;;  %v4007_v49 = vld [vmem:[%s4691_s4 + $0xf8] sm:$0xff]  }
 0x17b   : > { %3025 = vmatpush3.bf16.msra.mxu0 %v3979_v44  ;;  %3006 = vmatprep.subr.bf16.mxu1 %v3739_v50  ;;  %v4013_v50 = vld [vmem:[%s4691_s4 + $0x130] sm:$0xff]  }
 0x17c   : > { %3026 = vmatprep.subr.bf16.mxu0 %v3985_v25 }
 0x17e   : > { %3007 = vmatpush3.bf16.msra.mxu1 %v3752_v52  ;;  %v4021_v52 = vld [vmem:[%s4691_s4 + $0xf0] sm:$0xff]  }
 0x17f   : > { %3027 = vmatpush3.bf16.msra.mxu0 %v3993_v46  ;;  %3008 = vmatprep.subr.bf16.mxu1 %v3758_v53  ;;  %v3253_v53 = vunpack.i.h.bf16 %v3251_v39  ;;  %v3167_v39 = vpop.f32.mrf.mxu0 }
 0x180   : > { %3028 = vmatprep.subr.bf16.mxu0 %v3999_v47  ;;  %v4355_v39 = vld [vmem:[%s4691_s4 + $0x270] sm:$0xff]  }
 0x181   : > { %v1045_v29 = vsel %vm714_vm6, %v3253_v53, %v3856_v13  ;;  %v675_v9 = vpop.f32.mrf.mxu0 }
 0x182   : > { %3009 = vmatpush3.bf16.msra.mxu1 %v3771_v55  ;;  %v4037_v55 = vld [vmem:[%s4691_s4 + $0xe8] sm:$0xff]  }
 0x183   : > { %3029 = vmatpush3.bf16.msra.mxu0 %v4007_v49  ;;  %3010 = vmatprep.subr.bf16.mxu1 %v3777_v56  ;;  %v3258_v56 = vunpack.i.h.bf16 %v4029_v28  ;;  %v3168_v10 = vpop.f32.mrf.mxu0  ;;  %v3415_v28 = vld [vmem:[%s4691_s4 + $0x1c8] sm:$0xff]  }
 0x184   : > { %3030 = vmatprep.subr.bf16.mxu0 %v4013_v50 }
 0x185   : > { %v1051_v13 = vpack.c.bf16 %v3258_v56, %v3258_v56 }
 0x186   : > { %3011 = vmatpush3.bf16.msra.mxu1 %v3790_v58  ;;  %v4046_v58 = vld [vmem:[%s4691_s4 + $0x120] sm:$0xff]  }
 0x187   : > { %3031 = vmatpush3.bf16.msra.mxu0 %v4021_v52  ;;  %3012 = vmatprep.subr.bf16.mxu1 %v3820_v62  ;;  %v1048_v62 = vpack.c.bf16 %v1045_v29, %v1045_v29 }
 0x188   : > { %3032 = vmatprep.subr.bf16.mxu0 %v4027_v27 }
 0x18a   : > { %3013 = vmatpush3.bf16.msra.mxu1 %v3825_v63  ;;  %v4066_v63 = vld [vmem:[%s4691_s4 + $0x198] sm:$0xff]  }
 0x18b   : > { %3033 = vmatpush3.bf16.msra.mxu0 %v4037_v55  ;;  %1095 = vmatprep.subr.bf16.mxu1 %v3457_v2 }
 0x18c   : > { %3034 = vmatprep.subr.bf16.mxu0 %v4046_v58 }
 0x18d   : > { %1088 = vmatmul.mubr.bf16.vlgmr.msra.gmra.mxu1 %v1048_v62  ;;  %v3267_v62 = vunpack.i.l.bf16 %v4157_v16 }
 0x18e   : > { %1096 = vmatpush1.bf16.msra.mxu1 %v3666_v38  ;;  %2762 = vmatprep.mubr.msk.bf16.mxu1 %vm714_vm6, %v1051_v13  ;;  %v4077_v38 = vld [vmem:[%s4691_s4 + $0x190] sm:$0xff]  }
 0x18f   : > { %3035 = vmatpush3.bf16.msra.mxu0 %v4054_v33  ;;  %1097 = vmatprep.subr.bf16.mxu1 %v3457_v2  ;;  %v1509_v13 = vsel %vm714_vm6, %v3267_v62, %v3910_v3  ;;  %v1612_v3 = vrot.slane %v3915_v5, 6 }
 0x190   : > { %1451 = vmatprep.subr.bf16.mxu0 %v3457_v2 }
 0x192   : > { %1098 = vmatpush1.bf16.msra.mxu1 %v3682_v41  ;;  %1444 = vmatmul.mubr.bf16.vlgmr.msra.gmra.mxu0 %v1179_v35  ;;  %v4087_v41 = vld [vmem:[%s4691_s4 + $0x188] sm:$0xff]  }
 0x193   : > { %1452 = vmatpush1.bf16.msra.mxu0 %v4066_v63  ;;  %2848 = vmatprep.mubr.msk.bf16.mxu0 %vm714_vm6, %v1182_v26  ;;  %v4337_v26 = vpop.permute.xlu1 %3280 }
 0x194   : > { %1099 = vmatprep.subr.bf16.mxu1 %v3457_v2  ;;  %1453 = vmatprep.subr.bf16.mxu0 %v3457_v2 }
 0x196   : > { %1100 = vmatpush1.bf16.msra.mxu1 %v3707_v45  ;;  %v4096_v45 = vld [vmem:[%s4691_s4 + $0x180] sm:$0xff]  }
 0x197   : > { %1454 = vmatpush1.bf16.msra.mxu0 %v4077_v38  ;;  %1101 = vmatprep.subr.bf16.mxu1 %v3457_v2 }
 0x198   : > { %1455 = vmatprep.subr.bf16.mxu0 %v3457_v2 }
 0x19a   : > { %1102 = vmatpush1.bf16.msra.mxu1 %v3726_v48  ;;  %v4105_v48 = vld [vmem:[%s4691_s4 + $0x178] sm:$0xff]  }
 0x19b   : > { %1456 = vmatpush1.bf16.msra.mxu0 %v4087_v41  ;;  %1103 = vmatprep.subr.bf16.mxu1 %v3457_v2 }
 0x19c   : > { %1457 = vmatprep.subr.bf16.mxu0 %v3457_v2 }
 0x19e   : > { %1104 = vmatpush1.bf16.msra.mxu1 %v3745_v51  ;;  %v4114_v51 = vld [vmem:[%s4691_s4 + $0x170] sm:$0xff]  }
 0x19f   : > { %1458 = vmatpush1.bf16.msra.mxu0 %v4096_v45  ;;  %1105 = vmatprep.subr.bf16.mxu1 %v3457_v2 }
 0x1a0   : > { %1459 = vmatprep.subr.bf16.mxu0 %v3457_v2 }
 0x1a2   : > { %1106 = vmatpush1.bf16.msra.mxu1 %v3764_v54  ;;  %v4123_v54 = vld [vmem:[%s4691_s4 + $0x168] sm:$0xff]  }
 0x1a3   : > { %1460 = vmatpush1.bf16.msra.mxu0 %v4105_v48  ;;  %1107 = vmatprep.subr.bf16.mxu1 %v3457_v2 }
 0x1a4   : > { %1461 = vmatprep.subr.bf16.mxu0 %v3457_v2 }
 0x1a6   : > { %1108 = vmatpush1.bf16.msra.mxu1 %v3783_v57  ;;  %v4134_v57 = vld [vmem:[%s4691_s4 + $0x160] sm:$0xff]  }
 0x1a7   : > { %1462 = vmatpush1.bf16.msra.mxu0 %v4114_v51  ;;  %1109 = vmatprep.subr.bf16.mxu1 %v3457_v2 }
 0x1a8   : > { %1463 = vmatprep.subr.bf16.mxu0 %v3457_v2 }
 0x1aa   : > { %1110 = vmatpush1.bf16.msra.mxu1 %v3797_v59  ;;  %v4145_v59 = vld [vmem:[%s4691_s4 + $0x1b8] sm:$0xff]  }
 0x1ab   : > { %1464 = vmatpush1.bf16.msra.mxu0 %v4123_v54  ;;  %1119 = vmatprep.subr.bf16.mxu1 %v3457_v2 }
 0x1ac   : > { %1465 = vmatprep.subr.bf16.mxu0 %v3457_v2 }
 0x1ae   : > { %1120 = vmatpush2.bf16.msra.mxu1 %v3805_v60  ;;  %v4154_v60 = vld [vmem:[%s4691_s4 + $0x1b0] sm:$0xff]  }
 0x1af   : > { %1466 = vmatpush1.bf16.msra.mxu0 %v4134_v57  ;;  %1121 = vmatprep.subr.bf16.mxu1 %v3457_v2 }
 0x1b0   : > { %1475 = vmatprep.subr.bf16.mxu0 %v3457_v2 }
 0x1b2   : > { %1122 = vmatpush2.bf16.msra.mxu1 %v3812_v61  ;;  %v4167_v61 = vld [vmem:[%s4691_s4 + $0x1a8] sm:$0xff]  }
 0x1b3   : > { %1476 = vmatpush2.bf16.msra.mxu0 %v4145_v59  ;;  %1123 = vmatprep.subr.bf16.mxu1 %v3457_v2 }
 0x1b4   : > { %1477 = vmatprep.subr.bf16.mxu0 %v3457_v2 }
 0x1b6   : > { %1124 = vmatpush2.bf16.msra.mxu1 %v3830_v0  ;;  %v1050_v0 = vpack.c.bf16 %v1047_v23, %v1047_v23  ;;  %v4372_v23 = vld [vmem:[%s4691_s4 + $0x260] sm:$0xff]  }
 0x1b7   : > { %1478 = vmatpush2.bf16.msra.mxu0 %v4154_v60  ;;  %1125 = vmatprep.subr.bf16.mxu1 %v3457_v2 }
 0x1b8   : > { %1479 = vmatprep.subr.bf16.mxu0 %v3457_v2 }
 0x1ba   : > { %1126 = vmatpush2.bf16.msra.mxu1 %v3845_v7  ;;  %v4189_v7 = vld [vmem:[%s4691_s4 + $0x238] sm:$0xff]  }
 0x1bb   : > { %1480 = vmatpush2.bf16.msra.mxu0 %v4167_v61  ;;  %3042 = vmatprep.subr.bf16.mxu1 %v3867_v20  ;;  %v4197_v20 = vld [vmem:[%s4691_s4 + $0x1f8] sm:$0xff]  }
 0x1bc   : > { %1481 = vmatprep.subr.bf16.mxu0 %v3457_v2 }
 0x1bd   : > { %1128 = vmatmul.mubr.bf16.vlgmr.msra.gmra.mxu1 %v1050_v0  ;;  %v4386_v0 = vld [vmem:[%s4691_s4 + $0x250] sm:$0xff]  }
 0x1be   : > { %3043 = vmatpush3.bf16.msra.mxu1 %v3950_v22  ;;  %1549 = vmatprep.mubr.bf16.mxu1 %v1511_v36  ;;  %v4211_v22 = vld [vmem:[%s4691_s4 + $0x1f0] sm:$0xff]   ;;  %v4400_v36 = vld [vmem:[%s4691_s4 + $0x240] sm:$0xff]  }
 0x1bf   : > { %1482 = vmatpush2.bf16.msra.mxu0 %v4180_v43  ;;  %3044 = vmatprep.subr.bf16.mxu1 %v3955_v1  ;;  %v4217_v1 = vld [vmem:[%s4691_s4 + $0x228] sm:$0xff]  }
 0x1c0   : > { %3064 = vmatprep.subr.bf16.mxu0 %v4189_v7 }
 0x1c2   : > { %1484 = vmatmul.mubr.bf16.vlgmr.msra.gmra.mxu0 %v1181_v8  ;;  %3045 = vmatpush3.bf16.msra.mxu1 %v3963_v42  ;;  %v4225_v42 = vld [vmem:[%s4691_s4 + $0x1e8] sm:$0xff]   ;;  %v4414_v8 = vld [vmem:[%s4691_s4 + $0x290] sm:$0xff]  }
 0x1c3   : > { %3046 = vmatprep.subr.bf16.mxu1 %v3969_v18  ;;  %3065 = vmatpush3.bf16.msra.mxu0 %v4197_v20  ;;  %v4231_v18 = vld [vmem:[%s4691_s4 + $0x220] sm:$0xff]  }
 0x1c4   : > { %3066 = vmatprep.subr.bf16.mxu0 %v4203_v30 }
 0x1c6   : > { %3047 = vmatpush3.bf16.msra.mxu1 %v3979_v44  ;;  %v4239_v44 = vld [vmem:[%s4691_s4 + $0x1e0] sm:$0xff]  }
 0x1c7   : > { %3048 = vmatprep.subr.bf16.mxu1 %v3985_v25  ;;  %3067 = vmatpush3.bf16.msra.mxu0 %v4211_v22  ;;  %v4245_v25 = vld [vmem:[%s4691_s4 + $0x218] sm:$0xff]  }
 0x1c8   : > { %3068 = vmatprep.subr.bf16.mxu0 %v4217_v1 }
 0x1ca   : > { %3049 = vmatpush3.bf16.msra.mxu1 %v3993_v46  ;;  %v4253_v46 = vld [vmem:[%s4691_s4 + $0x1d8] sm:$0xff]  }
 0x1cb   : > { %3050 = vmatprep.subr.bf16.mxu1 %v3999_v47  ;;  %3069 = vmatpush3.bf16.msra.mxu0 %v4225_v42  ;;  %v4259_v47 = vld [vmem:[%s4691_s4 + $0x210] sm:$0xff]  }
 0x1cc   : > { %3070 = vmatprep.subr.bf16.mxu0 %v4231_v18 }
 0x1ce   : > { %3051 = vmatpush3.bf16.msra.mxu1 %v4007_v49  ;;  %v3263_v49 = vunpack.i.h.bf16 %v4137_v6 }
 0x1cf   : > { %3052 = vmatprep.subr.bf16.mxu1 %v4013_v50  ;;  %3071 = vmatpush3.bf16.msra.mxu0 %v4239_v44  ;;  %v4268_v50 = vld [vmem:[%s4691_s4 + $0x1d0] sm:$0xff]  }
 0x1d0   : > { %3072 = vmatprep.subr.bf16.mxu0 %v4245_v25  ;;  %v1507_v53 = vsel %vm714_vm6, %v3263_v49, %v3903_v37  ;;  %v3417_v37 = vld [vmem:[%s4691_s4 + $0x1c0] sm:$0xff]  }
 0x1d1   : > { %v1510_v56 = vpack.c.bf16 %v1507_v53, %v1507_v53 }
 0x1d2   : > { %3053 = vmatpush3.bf16.msra.mxu1 %v4021_v52  ;;  %v4274_v52 = vld [vmem:[%s4691_s4 + $0x208] sm:$0xff]  }
 0x1d3   : > { %3054 = vmatprep.subr.bf16.mxu1 %v4027_v27  ;;  %3073 = vmatpush3.bf16.msra.mxu0 %v4253_v46  ;;  %v3268_v27 = vunpack.i.h.bf16 %v4157_v16 }
 0x1d4   : > { %3074 = vmatprep.subr.bf16.mxu0 %v4259_v47 }
 0x1d5   : > { %v1513_v29 = vpack.c.bf16 %v3268_v27, %v3268_v27 }
 0x1d6   : > { %3055 = vmatpush3.bf16.msra.mxu1 %v4037_v55  ;;  %v3416_v55 = vld [vmem:[%s4691_s4 + $0x200] sm:$0xff]  }
 0x1d7   : > { %3056 = vmatprep.subr.bf16.mxu1 %v4046_v58  ;;  %3075 = vmatpush3.bf16.msra.mxu0 %v4268_v50  ;;  %v3276_v58 = vpop.permute.xlu0 %3275 }
 0x1d8   : > { %3076 = vmatprep.subr.bf16.mxu0 %v4274_v52  ;;  %v3277_v32 = vunpack.i.l.bf16 %v3276_v58  ;;  %v3278_v35 = vunpack.i.h.bf16 %v3276_v58 }
 0x1da   : > { %3057 = vmatpush3.bf16.msra.mxu1 %v4054_v33  ;;  %v1970_v33 = vsel %vm714_vm6, %v3277_v32, %v3915_v5 }
 0x1db   : > { %1557 = vmatprep.subr.bf16.mxu1 %v3457_v2  ;;  %3077 = vmatpush3.bf16.msra.mxu0 %v3415_v28  ;;  %v1973_v34 = vpack.c.bf16 %v1970_v33, %v1970_v33 }
 0x1dc   : > { %3078 = vmatprep.subr.bf16.mxu0 %v3416_v55 }
 0x1dd   : > { %1550 = vmatmul.mubr.bf16.vlgmr.msra.gmra.mxu1 %v1510_v56 }
 0x1de   : > { %1558 = vmatpush1.bf16.msra.mxu1 %v4066_v63  ;;  %2849 = vmatprep.mubr.msk.bf16.mxu1 %vm714_vm6, %v1513_v29  ;;  %v1512_v63 = vpack.c.bf16 %v1509_v13, %v1509_v13 }
 0x1df   : > { %1559 = vmatprep.subr.bf16.mxu1 %v3457_v2  ;;  %3079 = vmatpush3.bf16.msra.mxu0 %v3417_v37 }
 0x1e0   : > { %1913 = vmatprep.subr.bf16.mxu0 %v3457_v2 }
 0x1e2   : > { %1560 = vmatpush1.bf16.msra.mxu1 %v4077_v38  ;;  %v3283_v38 = vunpack.i.h.bf16 %v4337_v26 }
 0x1e3   : > { %1561 = vmatprep.subr.bf16.mxu1 %v3457_v2 }
 0x1e6   : > { %1562 = vmatpush1.bf16.msra.mxu1 %v4087_v41  ;;  %v4341_v41 = vsel %vm685_vm3, 0.0, %v1612_v3  ;;  %vm2254_vm3 = vcmask 1043456  }
 0x1e7   : > { %1563 = vmatprep.subr.bf16.mxu1 %v3457_v2  ;;  %v3284_v62 = vpack.i.bf16 %v4341_v41, %v3915_v5 }
 0x1ea   : > { %1564 = vmatpush1.bf16.msra.mxu1 %v4096_v45  ;;  %v1969_v45 = vsel %vm714_vm6, %v3278_v35, %v4341_v41 }
 0x1eb   : > { %1565 = vmatprep.subr.bf16.mxu1 %v3457_v2 }
 0x1ee   : > { %1566 = vmatpush1.bf16.msra.mxu1 %v4105_v48  ;;  %v1975_v48 = vpack.c.bf16 %v3283_v38, %v3283_v38 }
 0x1ef   : > { %1567 = vmatprep.subr.bf16.mxu1 %v3457_v2 }
 0x1f2   : > { %1568 = vmatpush1.bf16.msra.mxu1 %v4114_v51  ;;  %v4348_v51 = vld [vmem:[%s4691_s4 + $0x278] sm:$0xff]  }
 0x1f3   : > { %1569 = vmatprep.subr.bf16.mxu1 %v3457_v2 }
 0x1f6   : > { %1570 = vmatpush1.bf16.msra.mxu1 %v4123_v54  ;;  %v1972_v54 = vpack.c.bf16 %v1969_v45, %v1969_v45 }
 0x1f7   : > { %1571 = vmatprep.subr.bf16.mxu1 %v3457_v2 }
 0x1fa   : > { %1572 = vmatpush1.bf16.msra.mxu1 %v4134_v57 }
 0x1fb   : > { %1581 = vmatprep.subr.bf16.mxu1 %v3457_v2 }
 0x1fe   : > { %1582 = vmatpush2.bf16.msra.mxu1 %v4145_v59 }
 0x1ff   : > { %1583 = vmatprep.subr.bf16.mxu1 %v3457_v2 }
 0x202   : > { %1584 = vmatpush2.bf16.msra.mxu1 %v4154_v60  ;;  %v4363_v60 = vld [vmem:[%s4691_s4 + $0x268] sm:$0xff]  }
 0x203   : > { %1585 = vmatprep.subr.bf16.mxu1 %v3457_v2 }
 0x206   : > { %1586 = vmatpush2.bf16.msra.mxu1 %v4167_v61 }
 0x207   : > { %1587 = vmatprep.subr.bf16.mxu1 %v3457_v2 }
 0x20a   : > { %1588 = vmatpush2.bf16.msra.mxu1 %v4180_v43  ;;  %v4393_v43 = vld [vmem:[%s4691_s4 + $0x248] sm:$0xff]  }
 0x20b   : > { %3086 = vmatprep.subr.bf16.mxu1 %v4189_v7 }
 0x20d   : > { %1590 = vmatmul.mubr.bf16.vlgmr.msra.gmra.mxu1 %v1512_v63 }
 0x20e   : > { %3087 = vmatpush3.bf16.msra.mxu1 %v4197_v20  ;;  %2011 = vmatprep.mubr.bf16.mxu1 %v1973_v34 }
 0x20f   : > { %3088 = vmatprep.subr.bf16.mxu1 %v4203_v30  ;;  %v1621_v30 = vrot.slane %v3915_v5, 2  ;;  %v3461_v5 = vmov 1  }
 0x210   : > { %3290 = vset.pattern.permute.xlu1 %v3461_v5 }
 0x212   : > { %3089 = vmatpush3.bf16.msra.mxu1 %v4211_v22 }
 0x213   : > { %3090 = vmatprep.subr.bf16.mxu1 %v4217_v1 }
 0x216   : > { %3091 = vmatpush3.bf16.msra.mxu1 %v4225_v42  ;;  %v4422_v42 = vld [vmem:[%s4691_s4 + $0x288] sm:$0xff]  }
 0x217   : > { %3092 = vmatprep.subr.bf16.mxu1 %v4231_v18 }
 0x21a   : > { %3093 = vmatpush3.bf16.msra.mxu1 %v4239_v44  ;;  %v3282_v44 = vunpack.i.l.bf16 %v4337_v26 }
 0x21b   : > { %3094 = vmatprep.subr.bf16.mxu1 %v4245_v25 }
 0x21e   : > { %3095 = vmatpush3.bf16.msra.mxu1 %v4253_v46  ;;  %v1623_v46 = vsel %vm697_vm7, %v1621_v30, 0.0 }
 0x21f   : > { %3096 = vmatprep.subr.bf16.mxu1 %v4259_v47  ;;  %v1971_v53 = vsel %vm714_vm6, %v3282_v44, %v1623_v46 }
 0x222   : > { %3097 = vmatpush3.bf16.msra.mxu1 %v4268_v50  ;;  %v4431_v50 = vld [vmem:[%s4691_s4 + $0x280] sm:$0xff]  }
 0x223   : > { %3098 = vmatprep.subr.bf16.mxu1 %v4274_v52  ;;  %v4435_v52 = vpack.c.bf16 %v4127_v31, %v4127_v31 }
 0x226   : > { %3099 = vmatpush3.bf16.msra.mxu1 %v3415_v28  ;;  %v1974_v28 = vpack.c.bf16 %v1971_v53, %v1971_v53 }
 0x227   : > { %3100 = vmatprep.subr.bf16.mxu1 %v3416_v55  ;;  %v2108_v55 = vsel %vm714_vm6, %v4435_v52, 0 }
 0x22a   : > { %3101 = vmatpush3.bf16.msra.mxu1 %v3417_v37 }
 0x22b   : > { %2019 = vmatprep.subr.bf16.mxu1 %v3457_v2 }
 0x22d   : > { %2012 = vmatmul.mubr.bf16.vlgmr.msra.gmra.mxu1 %v1972_v54  ;;  %v2992_v57 = vpop.f32.mrf.mxu1 }
 0x22e   : > { %2020 = vmatpush1.bf16.msra.mxu1 %v4348_v51  ;;  %2936 = vmatprep.mubr.msk.bf16.mxu1 %vm714_vm6, %v1975_v48 }
 0x22f   : > { %v2993_v6 = vpop.f32.mrf.mxu1  ;;  %2021 = vmatprep.subr.bf16.mxu1 %v3457_v2 }
 0x230   : > { %v2994_v9 = vadd.f32 %v2993_v6, %v2992_v57 }
 0x231   : > { %v2995_v59 = vpop.f32.mrf.mxu1 }
 0x232   : > { %2022 = vmatpush1.bf16.msra.mxu1 %v4355_v39  ;;  %v1023_v10 = vpop.f32.mrf.mxu0 }
 0x233   : > { %v4365_v11 = vadd.f32 %v2994_v9, %v1023_v10  ;;  %v2996_v16 = vpop.f32.mrf.mxu1  ;;  %2023 = vmatprep.subr.bf16.mxu1 %v3457_v2 }
 0x234   : > { %v1025_v17 = vpop.f32.mrf.mxu0 }
 0x236   : > { %2024 = vmatpush1.bf16.msra.mxu1 %v4363_v60  ;;  %v1026_v61 = vpop.f32.mrf.mxu0 }
 0x237   : > { %2025 = vmatprep.subr.bf16.mxu1 %v3457_v2  ;;  %v2763_v61 = vld [vmem:[%s4692_s5] ss:$0 sm:$0xff] }
 0x238   : > { %v1027_v40 = vpop.f32.mrf.mxu0 }
 0x23a   : > { %2026 = vmatpush1.bf16.msra.mxu1 %v4372_v23 }
 0x23b   : > { %2027 = vmatprep.subr.bf16.mxu1 %v3457_v2 }
 0x23e   : > { %2028 = vmatpush1.bf16.msra.mxu1 %v4379_v12 }
 0x23f   : > { %2029 = vmatprep.subr.bf16.mxu1 %v3457_v2 }
 0x242   : > { %2030 = vmatpush1.bf16.msra.mxu1 %v4386_v0 }
 0x243   : > { %2031 = vmatprep.subr.bf16.mxu1 %v3457_v2 }
 0x246   : > { %2032 = vmatpush1.bf16.msra.mxu1 %v4393_v43 }
 0x247   : > { %2033 = vmatprep.subr.bf16.mxu1 %v3457_v2 }
 0x24a   : > { %2034 = vmatpush1.bf16.msra.mxu1 %v4400_v36 }
 0x24b   : > { %2043 = vmatprep.subr.bf16.mxu1 %v3457_v2 }
 0x24d   : > { %v3014_v7 = vpop.f32.mrf.mxu1 }
 0x24e   : > { %2044 = vmatpush2.bf16.msra.mxu1 %v4407_v19 }
 0x24f   : > { %v3015_v20 = vpop.f32.mrf.mxu1  ;;  %2045 = vmatprep.subr.bf16.mxu1 %v3457_v2 }
 0x250   : > { %v3016_v31 = vadd.f32 %v3015_v20, %v3014_v7  ;;  %v2939_v7 = vld [vmem:[%s4693_s6 + $0x1] ss:$0 sm:$0xff] }
 0x251   : > { %v3017_v22 = vpop.f32.mrf.mxu1 }
 0x252   : > { %v3036_v1 = vpop.f32.mrf.mxu0  ;;  %2046 = vmatpush2.bf16.msra.mxu1 %v4414_v8 }
 0x253   : > { %v3018_v18 = vpop.f32.mrf.mxu1  ;;  %2047 = vmatprep.subr.bf16.mxu1 %v3457_v2 }
 0x254   : > { %v3037_v25 = vpop.f32.mrf.mxu0 }
 0x255   : > { %v3038_v47 = vadd.f32 %v3037_v25, %v3036_v1 }
 0x256   : > { %v3039_v49 = vpop.f32.mrf.mxu0  ;;  %2048 = vmatpush2.bf16.msra.mxu1 %v4422_v42 }
 0x257   : > { %2049 = vmatprep.subr.bf16.mxu1 %v3457_v2 }
 0x258   : > { %v3040_v27 = vpop.f32.mrf.mxu0 }
 0x25a   : > { %2050 = vmatpush2.bf16.msra.mxu1 %v4431_v50 }
 0x25b   : > { %3169 = vmatprep.subr.bf16.mxu1 %v3458_v4 }
 0x25d   : > { %2052 = vmatmul.mubr.bf16.vlgmr.msra.gmra.mxu1 %v1974_v28 }
 0x25e   : > { %3170 = vmatpush3.bf16.xpose.msra.mxu1 %v2108_v55  ;;  %3171 = vmatprep.mubr.msk.bf16.mxu1 %vm3459_vm0, %v3458_v4 }
 0x25f   : > { %3175 = vmatprep.subr.bf16.mxu1 %v3458_v4 }
 0x27d   : > { %v1129_v56 = vpop.f32.mrf.mxu1 }
 0x27e   : > { %v1130_v29 = vadd.f32 %v3016_v31, %v1129_v56 }
 0x27f   : > { %v1131_v37 = vpop.f32.mrf.mxu1 }
 0x280   : > { %1136 = vrot.lane.b32.xlu0 %v1130_v29, %s3460_s16 }
 0x281   : > { %v1132_v58 = vpop.f32.mrf.mxu1 }
 0x282   : > { %v1485_v32 = vpop.f32.mrf.mxu0 }
 0x283   : > { %v4449_v33 = vadd.f32 %v3038_v47, %v1485_v32  ;;  %v1133_v13 = vpop.f32.mrf.mxu1 }
 0x284   : > { %3285 = vrot.lane.b32.xlu0 %v3284_v62, %s3460_s16  ;;  %v1487_v34 = vpop.f32.mrf.mxu0  ;;  %v3462_v13 = vmov 2  }
 0x285   : > { %v3463_v34 = vmov 3  }
 0x286   : > { %v1488_v63 = vpop.f32.mrf.mxu0 }
 0x288   : > { %v1489_v3 = vpop.f32.mrf.mxu0 }
 0x29d   : > { %v3058_v35 = vpop.f32.mrf.mxu1 }
 0x29f   : > { %v3059_v26 = vpop.f32.mrf.mxu1 }
 0x2a0   : > { %v3060_v48 = vadd.f32 %v3059_v26, %v3058_v35  ;;  %v3464_v35 = vmov 4   ;;  %v3465_v26 = vmov 6  }
 0x2a1   : > { %v3061_v38 = vpop.f32.mrf.mxu1 }
 0x2a2   : > { %v3466_v38 = vmov 5  }
 0x2a3   : > { %v3062_v45 = vpop.f32.mrf.mxu1 }
 0x2a4   : > { %v3467_v45 = vmov 7  }
 0x2cd   : > { %v1591_v54 = vpop.f32.mrf.mxu1 }
 0x2ce   : > { %v1592_v57 = vadd.f32 %v3060_v48, %v1591_v54 }
 0x2cf   : > { %v1593_v6 = vpop.f32.mrf.mxu1 }
 0x2d0   : > { %1598 = vrot.lane.b32.xlu1 %v1592_v57, %s3460_s16 }
 0x2d1   : > { %v1594_v9 = vpop.f32.mrf.mxu1 }
 0x2d3   : > { %v1595_v41 = vpop.f32.mrf.mxu1 }
 0x2d4   : > { %1635 = vrot.lane.b32.xlu1 %v1623_v46, %s3460_s16 }
 0x2ed   : > { %v3102_v59 = vpop.f32.mrf.mxu1 }
 0x2ef   : > { %v3103_v10 = vpop.f32.mrf.mxu1 }
 0x2f0   : > { %v3104_v16 = vadd.f32 %v3103_v10, %v3102_v59 }
 0x2f1   : > { %v3105_v17 = vpop.f32.mrf.mxu1 }
 0x2f2   : > { %v1137_v40 = vpop.permute.xlu0 %1136  ;;  %v2089_v17 = vlaneseq }
 0x2f3   : > { %v1139_v20 = vsel %vm714_vm6, %v4365_v11, %v1137_v40  ;;  %v3106_v30 = vpop.f32.mrf.mxu1  ;;  %v1644_v11 = vpack.c.bf16 %v3934_v24, %v3934_v24 }
 0x2f4   : > { %v1145_v22 = vadd.f32 %v2763_v61, %v1139_v20  ;;  %v4533_v61 = vshrl.u32 %v2089_v17, 7 }
 0x2f6   : > { %v2083_v1 = vadd.f32 %v2939_v7, %v1145_v22  ;;  %v3286_v18 = vpop.permute.xlu0 %3285 }
 0x2f7   : > { %v3288_v44 = vunpack.i.h.bf16 %v3286_v18  ;;  %v3287_v25 = vunpack.i.l.bf16 %v3286_v18 }
 0x2f8   : > { %v2084_v46 = vmul.f32 0.125, %v2083_v1 }
 0x2f9   : > { %v1638_v47 = vsel %vm714_vm6, %v3920_v14, %v3288_v44  ;;  %v1639_v49 = vsel %vm714_vm6, %v3923_v15, %v3287_v25 }
 0x2fa   : > { %v4467_v53 = vpack.c.bf16 %v2084_v46, %v2084_v46  ;;  %v1641_v27 = vpack.c.bf16 %v1638_v47, %v1638_v47  ;;  %v1642_v28 = vpack.c.bf16 %v1639_v49, %v1639_v49 }
 0x2fc   : > { %1905 = vmatprep.mubr.bf16.mxu0 %v1642_v28  ;;  %3172 = vmatmul.mubr.msk.bf16.vlgmr.msra.gmra.mxu1 %vm714_vm6, %v4467_v53 }
 0x2fd   : > { %1906 = vmatmul.mubr.bf16.vlgmr.msra.gmra.mxu0 %v1641_v27  ;;  %3177 = vmatprep.mubr.msk.bf16.mxu1 %vm3459_vm0, %v3458_v4 }
 0x2fe   : > { %2935 = vmatprep.mubr.msk.bf16.mxu0 %vm714_vm6, %v1644_v11  ;;  %1914 = vmatpush1.bf16.msra.mxu0 %v4348_v51 }
 0x2ff   : > { %1915 = vmatprep.subr.bf16.mxu0 %v3457_v2 }
 0x302   : > { %1916 = vmatpush1.bf16.msra.mxu0 %v4355_v39 }
 0x303   : > { %1917 = vmatprep.subr.bf16.mxu0 %v3457_v2 }
 0x306   : > { %1918 = vmatpush1.bf16.msra.mxu0 %v4363_v60  ;;  %v2850_v60 = vld [vmem:[%s4692_s5 + $0x1] ss:$0 sm:$0xff] }
 0x307   : > { %1919 = vmatprep.subr.bf16.mxu0 %v3457_v2 }
 0x30a   : > { %1920 = vmatpush1.bf16.msra.mxu0 %v4372_v23 }
 0x30b   : > { %1921 = vmatprep.subr.bf16.mxu0 %v3457_v2 }
 0x30e   : > { %1922 = vmatpush1.bf16.msra.mxu0 %v4379_v12  ;;  %v2938_v12 = vld [vmem:[%s4693_s6] ss:$0 sm:$0xff] }
 0x30f   : > { %1923 = vmatprep.subr.bf16.mxu0 %v3457_v2 }
 0x312   : > { %1924 = vmatpush1.bf16.msra.mxu0 %v4386_v0 }
 0x313   : > { %1925 = vmatprep.subr.bf16.mxu0 %v3457_v2 }
 0x316   : > { %1926 = vmatpush1.bf16.msra.mxu0 %v4393_v43 }
 0x317   : > { %1927 = vmatprep.subr.bf16.mxu0 %v3457_v2 }
 0x31a   : > { %1928 = vmatpush1.bf16.msra.mxu0 %v4400_v36  ;;  %v2075_v36 = vadd.f32 %v2938_v12, %v1145_v22 }
 0x31b   : > { %1937 = vmatprep.subr.bf16.mxu0 %v3457_v2 }
 0x31c   : > { %v2076_v31 = vmul.f32 0.125, %v2075_v36 }
 0x31d   : > { %v2053_v14 = vpop.f32.mrf.mxu1 }
 0x31e   : > { %v4492_v15 = vadd.f32 %v3104_v16, %v2053_v14  ;;  %1938 = vmatpush2.bf16.msra.mxu0 %v4407_v19  ;;  %v4519_v56 = vpack.c.bf16 %v2076_v31, %v2076_v31 }
 0x31f   : > { %v2055_v24 = vpop.f32.mrf.mxu1  ;;  %1939 = vmatprep.subr.bf16.mxu0 %v3457_v2 }
 0x321   : > { %v2056_v51 = vpop.f32.mrf.mxu1 }
 0x322   : > { %1940 = vmatpush2.bf16.msra.mxu0 %v4414_v8 }
 0x323   : > { %v2057_v39 = vpop.f32.mrf.mxu1  ;;  %1941 = vmatprep.subr.bf16.mxu0 %v3457_v2 }
 0x326   : > { %1942 = vmatpush2.bf16.msra.mxu0 %v4422_v42 }
 0x327   : > { %1943 = vmatprep.subr.bf16.mxu0 %v3457_v2 }
 0x32a   : > { %1944 = vmatpush2.bf16.msra.mxu0 %v4431_v50 }
 0x32b   : > { %3181 = vmatprep.subr.bf16.mxu0 %v3458_v4 }
 0x342   : > { %v1599_v23 = vpop.permute.xlu1 %1598 }
 0x343   : > { %v1601_v0 = vsel %vm714_vm6, %v4449_v33, %v1599_v23 }
 0x344   : > { %v1607_v43 = vadd.f32 %v2850_v60, %v1601_v0 }
 0x346   : > { %v4510_v19 = vpack.c.bf16 %v1607_v43, %v1607_v43  ;;  %v1636_v8 = vpop.permute.xlu1 %1635 }
 0x347   : > { %v1640_v42 = vsel %vm714_vm6, %v3931_v21, %v1636_v8 }
 0x348   : > { %v1643_v50 = vpack.c.bf16 %v1640_v42, %v1640_v42  ;;  %v2195_v55 = vsel %vm714_vm6, %v4510_v19, 0 }
 0x349   : > { %3176 = vmatpush3.bf16.xpose.msra.mxu1 %v2195_v55 }
 0x34a   : > { %1946 = vmatmul.mubr.bf16.vlgmr.msra.gmra.mxu0 %v1643_v50  ;;  %3199 = vmatprep.subr.bf16.mxu1 %v3458_v4 }
 0x34b   : > { %3183 = vmatprep.mubr.msk.bf16.mxu0 %vm3459_vm0, %v3458_v4 }
 0x350   : > { %3178 = vmatmul.mubr.msk.bf16.vlgmr.msra.gmra.mxu1 %vm714_vm6, %v4519_v56 }
 0x351   : > { %3201 = vmatprep.mubr.msk.bf16.mxu1 %vm3459_vm0, %v3458_v4 }
 0x3bc   : > { %v2144_v21 = vpop.f32.mrf.mxu1 }
 0x3bd   : > { %v3080_v29 = vpop.f32.mrf.mxu0  ;;  %2157 = vperm.xlu1 %3290, %v2144_v21   ;;  %2152 = vperm.xlu0 %3289, %v2144_v21  }
 0x3be   : > { %v3173_v37 = vpop.f32.mrf.mxu1 }
 0x3bf   : > { %v3081_v58 = vpop.f32.mrf.mxu0 }
 0x3c0   : > { %v3082_v32 = vadd.f32 %v3081_v58, %v3080_v29  ;;  %v2147_v62 = vpop.f32.mrf.mxu1 }
 0x3c1   : > { %v3083_v33 = vpop.f32.mrf.mxu0  ;;  %3291 = vset.pattern.permute.xlu1 %v3462_v13  ;;  %3292 = vset.pattern.permute.xlu0 %v3463_v34 }
 0x3c2   : > { %2162 = vperm.xlu1 %3291, %v2144_v21   ;;  %2167 = vperm.xlu0 %3292, %v2144_v21   ;;  %v3174_v63 = vpop.f32.mrf.mxu1 }
 0x3c3   : > { %v3084_v3 = vpop.f32.mrf.mxu0 }
 0x3c6   : > { %3293 = vset.pattern.permute.xlu1 %v3464_v35  ;;  %3295 = vset.pattern.permute.xlu0 %v3465_v26 }
 0x3c7   : > { %2172 = vperm.xlu1 %3293, %v2144_v21   ;;  %2182 = vperm.xlu0 %3295, %v2144_v21  }
 0x3cb   : > { %3294 = vset.pattern.permute.xlu1 %v3466_v38  ;;  %3297 = vset.pattern.permute.xlu0 %v3457_v2  ;;  %v4535_v2 = vand.u32 127, %v2089_v17 }
 0x3cc   : > { %2177 = vperm.xlu1 %3294, %v2144_v21  }
 0x3cd   : > { %v2093_v40 = vsub.s32 %v4535_v2, %v4533_v61  ;;  %vm2103_vm1 = vcmp.gt.s32.totalorder %v4535_v2, %v4533_v61 }
 0x3cf   : > { %v4539_v20 = vadd.s32 7, %v2093_v40 }
 0x3d0   : > { %3296 = vset.pattern.permute.xlu1 %v3467_v45 }
 0x3d1   : > { %2187 = vperm.xlu1 %3296, %v2144_v21   ;;  %vm2095_vm8 = vcmp.eq.s32.totalorder %v4539_v20, 0  ;;  %vm2096_vm9 = vcmp.eq.s32.totalorder %v4539_v20, 1  ;;  %vm2097_vm10 = vcmp.eq.s32.totalorder %v4539_v20, 2  ;;  %vm2098_vm11 = vcmp.eq.s32.totalorder %v4539_v20, 3 }
 0x3d2   : > { %vm2099_vm12 = vcmp.eq.s32.totalorder %v4539_v20, 4  ;;  %vm2100_vm13 = vcmp.eq.s32.totalorder %v4539_v20, 5  ;;  %vm2101_vm14 = vcmp.eq.s32.totalorder %v4539_v20, 6  ;;  %vm2102_vm15 = vcmp.eq.s32.totalorder %v4539_v20, 7 }
 0x3d5   : > { %3298 = vset.pattern.permute.xlu1 %v3461_v5 }
 0x40a   : > { %v1947_v48 = vpop.f32.mrf.mxu0 }
 0x40b   : > { %v1948_v54 = vadd.f32 %v3082_v32, %v1947_v48 }
 0x40c   : > { %v1949_v57 = vpop.f32.mrf.mxu0 }
 0x40e   : > { %v1950_v6 = vpop.f32.mrf.mxu0 }
 0x410   : > { %v1951_v9 = vpop.f32.mrf.mxu0  ;;  %v2231_v41 = vpop.f32.mrf.mxu1 }
 0x412   : > { %v3179_v59 = vpop.f32.mrf.mxu1 }
 0x414   : > { %v2234_v10 = vpop.f32.mrf.mxu1 }
 0x416   : > { %v3180_v16 = vpop.f32.mrf.mxu1 }
 0x438   : > { %v2158_v7 = vpop.permute.xlu1 %2157  ;;  %v2153_v5 = vpop.permute.xlu0 %2152 }
 0x439   : > { %v2155_v22 = vsel %vm2095_vm8, %v2153_v5, 0.0 }
 0x43a   : > { %v2160_v18 = vsel %vm2096_vm9, %v2158_v7, %v2155_v22 }
 0x43d   : > { %v2163_v30 = vpop.permute.xlu1 %2162  ;;  %v2168_v25 = vpop.permute.xlu0 %2167 }
 0x43e   : > { %v2165_v44 = vsel %vm2097_vm10, %v2163_v30, %v2160_v18 }
 0x43f   : > { %v2170_v46 = vsel %vm2098_vm11, %v2168_v25, %v2165_v44 }
 0x442   : > { %v2173_v1 = vpop.permute.xlu1 %2172  ;;  %v2183_v28 = vpop.permute.xlu0 %2182 }
 0x443   : > { %v2175_v49 = vsel %vm2099_vm12, %v2173_v1, %v2170_v46 }
 0x447   : > { %v2178_v47 = vpop.permute.xlu1 %2177 }
 0x448   : > { %v2180_v27 = vsel %vm2100_vm13, %v2178_v47, %v2175_v49 }
 0x449   : > { %v2185_v14 = vsel %vm2101_vm14, %v2183_v28, %v2180_v27 }
 0x44c   : > { %v2188_v11 = vpop.permute.xlu1 %2187 }
 0x44d   : > { %v2190_v24 = vsel %vm2102_vm15, %v2188_v11, %v2185_v14 }
 0x44e   : > { %v2232_v51 = vadd.f32 %v2231_v41, %v2190_v24 }
 0x450   : > { %v2237_v39 = vsel %vm2103_vm1, -1e+30, %v2232_v51 }
 0x451   : > { %v2239_v60 = vsel %vm2238_vm2, %v2237_v39, -inf }
 0x452   : > { %2240 = vmax.xlane.f32.xlu1 %v2239_v60 }
 0x463   : > { %2302 = vrot.lane.b32.xlu1 %v4435_v52, %s3460_s16 }
 0x467   : > { %2299 = vrot.lane.b32.xlu1 %v4467_v53, %s3460_s16  ;;  %v2937_v53 = vld [vmem:[%s4692_s5 + $0x2] ss:$0 sm:$0xff] }
 0x46b   : > { %2392 = vrot.lane.b32.xlu1 %v4519_v56, %s3460_s16 }
 0x4db   : > { %v2241_v23 = vpop.xlane.xlu1 %2240 }
 0x4dc   : > { %v2242_v12 = vsub.f32 %v2237_v39, %v2241_v23  ;;  %v3430_v23 = vld [vmem:[%s4694_s7 + $0x38] sm:$0xff]  }
 0x4de   : > { %v2243_v0 = vmul.f32 1.442695, %v2242_v12  ;;  %v3431_v12 = vld [vmem:[%s4694_s7 + $0x30] sm:$0xff]  }
 0x4df   : > { %v2303_v56 = vpop.permute.xlu1 %2302 }
 0x4e0   : > { %3438 = vpow2.f32 %v2243_v0  ;;  %v2308_v29 = vsel %vm714_vm6, %v2303_v56, 0  ;;  %v3432_v0 = vld [vmem:[%s4694_s7 + $0x28] sm:$0xff]  }
 0x4e3   : > { %v2300_v58 = vpop.permute.xlu1 %2299 }
 0x4e7   : > { %v2393_v62 = vpop.permute.xlu1 %2392 }
 0x4ed   : > { %v3439_v43 = vpop.eup %3438 }
 0x4ee   : > { %v2245_v36 = vsel %vm2238_vm2, %v3439_v43, 0.0 }
 0x4ef   : > { %2246 = vadd.xlane.f32.xlu0 %v2245_v36  ;;  %v3434_v36 = vld [vmem:[%s4694_s7 + $0x18] sm:$0xff]  }
 0x505   : > { %2060 = vrot.lane.b32.xlu0 %v4492_v15, %s3460_s16 }
 0x509   : > { %2395 = vrot.lane.b32.xlu0 %v4510_v19, %s3460_s16 }
 0x578   : > { %v2247_v52 = vpop.xlane.xlu0 %2246 }
 0x579   : > { %3440 = vrcp.f32 %v2247_v52  ;;  %v3435_v52 = vld [vmem:[%s4694_s7 + $0x10] sm:$0xff]  }
 0x57c   : > { %v2061_v8 = vpop.permute.xlu0 %2060 }
 0x57d   : > { %v2063_v42 = vsel %vm714_vm6, %v1948_v54, %v2061_v8  ;;  %v3437_v8 = vld [vmem:[%s4694_s7] sm:$0xff]  }
 0x57e   : > { %v2069_v50 = vadd.f32 %v2937_v53, %v2063_v42  ;;  %v3436_v53 = vld [vmem:[%s4694_s7 + $0x8] sm:$0xff]  }
 0x580   : > { %v4586_v55 = vpack.c.bf16 %v2069_v50, %v2069_v50  ;;  %v2396_v37 = vpop.permute.xlu0 %2395 }
 0x581   : > { %v2401_v32 = vsel %vm714_vm6, %v2396_v37, 0 }
 0x582   : > { %v2256_v31 = vsel %vm2254_vm3, %v4586_v55, 0 }
 0x583   : > { %3182 = vmatpush3.bf16.msra.mxu0 %v2256_v31 }
 0x584   : > { %3187 = vmatprep.subr.bf16.mxu0 %v3458_v4 }
 0x586   : > { %v3441_v15 = vpop.eup %3440 }
 0x587   : > { %v2249_v19 = vmul.f32 %v3441_v15, %v3439_v43  ;;  %v3433_v43 = vld [vmem:[%s4694_s7 + $0x20] sm:$0xff]  }
 0x589   : > { %v2250_v21 = vpack.c.bf16 %v2249_v19, %v2249_v19 }
 0x58b   : > { %3184 = vmatmul.mubr.msk.bf16.vlgmr.msra.gmra.mxu0 %vm2238_vm2, %v2250_v21 }
 0x58c   : > { %3188 = vmatpush3.bf16.xpose.msra.mxu0 %v2308_v29  ;;  %3189 = vmatprep.mubr.msk.bf16.mxu0 %vm3459_vm0, %v3458_v4  ;;  %v3448_v29 = vld [vmem:[%s3596_s29] sm:$0xff] }
 0x58d   : > { %3193 = vmatprep.subr.bf16.mxu0 %v3458_v4 }
 0x593   : > { %3190 = vmatmul.mubr.msk.bf16.vlgmr.msra.gmra.mxu0 %vm714_vm6, %v2300_v58 }
 0x594   : > { %3194 = vmatpush3.bf16.xpose.msra.mxu0 %v2401_v32  ;;  %3195 = vmatprep.mubr.msk.bf16.mxu0 %vm3459_vm0, %v3458_v4 }
 0x595   : > { %3205 = vmatprep.subr.bf16.mxu0 %v3458_v4 }
 0x59b   : > { %3196 = vmatmul.mubr.msk.bf16.vlgmr.msra.gmra.mxu0 %vm714_vm6, %v2393_v62 }
 0x59c   : > { %3221 = vmatprep.mubr.msk.bf16.mxu0 %vm3459_vm0, %v3458_v4  ;;  %3206 = vmatpush3.bf16.msra.mxu0 %v3430_v23 }
 0x59d   : > { %3207 = vmatprep.subr.bf16.mxu0 %v3458_v4 }
 0x5a0   : > { %3208 = vmatpush3.bf16.msra.mxu0 %v3431_v12 }
 0x5a1   : > { %3209 = vmatprep.subr.bf16.mxu0 %v3458_v4 }
 0x5a4   : > { %3210 = vmatpush3.bf16.msra.mxu0 %v3432_v0 }
 0x5a5   : > { %3211 = vmatprep.subr.bf16.mxu0 %v3458_v4 }
 0x5a8   : > { %3212 = vmatpush3.bf16.msra.mxu0 %v3433_v43 }
 0x5a9   : > { %3213 = vmatprep.subr.bf16.mxu0 %v3458_v4 }
 0x5ac   : > { %3214 = vmatpush3.bf16.msra.mxu0 %v3434_v36 }
 0x5ad   : > { %3215 = vmatprep.subr.bf16.mxu0 %v3458_v4 }
 0x5b0   : > { %3216 = vmatpush3.bf16.msra.mxu0 %v3435_v52 }
 0x5b1   : > { %3217 = vmatprep.subr.bf16.mxu0 %v3458_v4 }
 0x5b4   : > { %3218 = vmatpush3.bf16.msra.mxu0 %v3436_v53 }
 0x5b5   : > { %3219 = vmatprep.subr.bf16.mxu0 %v3458_v4 }
 0x5b8   : > { %3220 = vmatpush3.bf16.msra.mxu0 %v3437_v8 }
 0x64b   : > { %v4604_v33 = vpop.f32.mrf.mxu0 }
 0x64d   : > { %v3185_v63 = vpop.f32.mrf.mxu0 }
 0x64f   : > { %v2295_v3 = vpop.f32.mrf.mxu0 }
 0x651   : > { %v3186_v48 = vpop.f32.mrf.mxu0 }
 0x653   : > { %v2344_v54 = vpop.f32.mrf.mxu0 }
 0x654   : > { %2357 = vperm.xlu1 %3298, %v2344_v54   ;;  %2352 = vperm.xlu0 %3297, %v2344_v54  }
 0x655   : > { %v3191_v57 = vpop.f32.mrf.mxu0 }
 0x657   : > { %v2347_v6 = vpop.f32.mrf.mxu0 }
 0x658   : > { %3299 = vset.pattern.permute.xlu1 %v3462_v13  ;;  %3300 = vset.pattern.permute.xlu0 %v3463_v34 }
 0x659   : > { %2362 = vperm.xlu1 %3299, %v2344_v54   ;;  %2367 = vperm.xlu0 %3300, %v2344_v54   ;;  %v3192_v9 = vpop.f32.mrf.mxu0 }
 0x65a   : > { %v2954_v9 = vld [vmem:[%s4695_s8] ss:$0 sm:$0xff] }
 0x65b   : > { %v2437_v41 = vpop.f32.mrf.mxu0 }
 0x65d   : > { %3301 = vset.pattern.permute.xlu1 %v3464_v35  ;;  %3303 = vset.pattern.permute.xlu0 %v3465_v26  ;;  %v3197_v59 = vpop.f32.mrf.mxu0 }
 0x65e   : > { %2372 = vperm.xlu1 %3301, %v2344_v54   ;;  %2382 = vperm.xlu0 %3303, %v2344_v54   ;;  %v2955_v59 = vld [vmem:[%s4695_s8 + $0x1] ss:$0 sm:$0xff] }
 0x65f   : > { %v2440_v10 = vpop.f32.mrf.mxu0 }
 0x661   : > { %v3198_v16 = vpop.f32.mrf.mxu0 }
 0x662   : > { %3302 = vset.pattern.permute.xlu1 %v3466_v38  ;;  %3305 = vset.pattern.permute.xlu0 %v3467_v45 }
 0x663   : > { %2377 = vperm.xlu1 %3302, %v2344_v54  }
 0x667   : > { %3304 = vset.pattern.permute.xlu1 %v3467_v45 }
 0x668   : > { %2387 = vperm.xlu1 %3304, %v2344_v54  }
 0x6cf   : > { %v2358_v13 = vpop.permute.xlu1 %2357  ;;  %v2353_v34 = vpop.permute.xlu0 %2352 }
 0x6d0   : > { %v2355_v35 = vsel %vm2095_vm8, %v2353_v34, 0.0 }
 0x6d1   : > { %v2360_v40 = vsel %vm2096_vm9, %v2358_v13, %v2355_v35 }
 0x6d4   : > { %v2363_v17 = vpop.permute.xlu1 %2362  ;;  %v2368_v7 = vpop.permute.xlu0 %2367 }
 0x6d5   : > { %v2365_v38 = vsel %vm2097_vm10, %v2363_v17, %v2360_v40 }
 0x6d6   : > { %v2370_v5 = vsel %vm2098_vm11, %v2368_v7, %v2365_v38 }
 0x6d9   : > { %v2373_v26 = vpop.permute.xlu1 %2372  ;;  %v2383_v1 = vpop.permute.xlu0 %2382 }
 0x6da   : > { %v2375_v45 = vsel %vm2099_vm12, %v2373_v26, %v2370_v5 }
 0x6de   : > { %v2378_v30 = vpop.permute.xlu1 %2377 }
 0x6df   : > { %v2380_v22 = vsel %vm2100_vm13, %v2378_v30, %v2375_v45 }
 0x6e0   : > { %v2385_v18 = vsel %vm2101_vm14, %v2383_v1, %v2380_v22 }
 0x6e3   : > { %v2388_v44 = vpop.permute.xlu1 %2387 }
 0x6e4   : > { %v2390_v25 = vsel %vm2102_vm15, %v2388_v44, %v2385_v18 }
 0x6e5   : > { %v2438_v46 = vadd.f32 %v2437_v41, %v2390_v25 }
 0x6e7   : > { %v2443_v47 = vsel %vm2103_vm1, -1e+30, %v2438_v46 }
 0x6e8   : > { %v2444_v49 = vsel %vm2238_vm2, %v2443_v47, -inf }
 0x6e9   : > { %2445 = vmax.xlane.f32.xlu1 %v2444_v49 }
 0x772   : > { %v2446_v27 = vpop.xlane.xlu1 %2445 }
 0x773   : > { %v2447_v28 = vsub.f32 %v2443_v47, %v2446_v27 }
 0x775   : > { %v2448_v11 = vmul.f32 1.442695, %v2447_v28 }
 0x777   : > { %3442 = vpow2.f32 %v2448_v11 }
 0x784   : > { %v3443_v14 = vpop.eup %3442 }
 0x785   : > { %v2450_v24 = vsel %vm2238_vm2, %v3443_v14, 0.0 }
 0x786   : > { %2451 = vadd.xlane.f32.xlu0 %v2450_v24 }
 0x79c   : > { %2457 = vrot.lane.b32.xlu0 %v4586_v55, %s3460_s16 }
 0x80f   : > { %v2452_v20 = vpop.xlane.xlu0 %2451 }
 0x810   : > { %3444 = vrcp.f32 %v2452_v20 }
 0x813   : > { %v2458_v51 = vpop.permute.xlu0 %2457 }
 0x814   : > { %v2463_v61 = vsel %vm2254_vm3, %v2458_v51, 0 }
 0x815   : > { %3200 = vmatpush3.bf16.msra.mxu1 %v2463_v61 }
 0x81d   : > { %v3445_v2 = vpop.eup %3444 }
 0x81e   : > { %v2454_v39 = vmul.f32 %v3445_v2, %v3443_v14 }
 0x820   : > { %v2455_v60 = vpack.c.bf16 %v2454_v39, %v2454_v39 }
 0x822   : > { %3202 = vmatmul.mubr.msk.bf16.vlgmr.msra.gmra.mxu1 %vm2238_vm2, %v2455_v60 }
 0x8e2   : > { %v2499_v42 = vpop.f32.mrf.mxu1 }
 0x8e3   : > { %2506 = vrot.lane.b32.xlu1 %v2499_v42, %s3460_s16 }
 0x8e4   : > { %v3203_v50 = vpop.f32.mrf.mxu1 }
 0x8e6   : > { %v2502_v55 = vpop.f32.mrf.mxu1 }
 0x8e8   : > { %v3204_v31 = vpop.f32.mrf.mxu1 }
 0x955   : > { %v2507_v15 = vpop.permute.xlu1 %2506 }
 0x956   : > { %v2509_v19 = vsel %vm714_vm6, %v4604_v33, %v2507_v15 }
 0x957   : > { %v2510_v56 = vpack.c.bf16 %v2509_v19, %v2509_v19 }
 0x959   : > { %3222 = vmatmul.mubr.bf16.vlgmr.msra.gmra.mxu0 %v2510_v56 }
 0xa19   : > { %v2609_v21 = vpop.f32.mrf.mxu0 }
 0xa1a   : > { %v2615_v4 = vadd.f32 %v3448_v29, %v2609_v21 }
 0xa1b   : > { %v3223_v37 = vpop.f32.mrf.mxu0 }
 0xa1c   : > { %2616 = vadd.xlane.f32.xlu1 %v2615_v4 }
 0xa1d   : > { %v2612_v58 = vpop.f32.mrf.mxu0 }
 0xa1f   : > { %v3224_v32 = vpop.f32.mrf.mxu0 }
 0xaa5   : > { %v2617_v62 = vpop.xlane.xlu1 %2616 }
 0xaa6   : > { %v2619_v63 = vmul.f32 0.0078125, %v2617_v62 }
 0xaa8   : > { %v2620_v3 = vsub.f32 %v2615_v4, %v2619_v63 }
 0xaaa   : > { %v2621_v48 = vmul.f32 %v2620_v3, %v2620_v3 }
 0xaac   : > { %2622 = vadd.xlane.f32.xlu0 %v2621_v48 }
 0xb35   : > { %v2623_v54 = vpop.xlane.xlu0 %2622 }
 0xb36   : > { %v2624_v57 = vmul.f32 0.0078125, %v2623_v54 }
 0xb38   : > { %v2625_v6 = vadd.f32 1e-05, %v2624_v57 }
 0xb3a   : > { %3446 = vrsqrt.f32 %v2625_v6 }
 0xb47   : > { %v3447_v33 = vpop.eup %3446 }
 0xb48   : > { %v2627_v41 = vmul.f32 %v3447_v33, %v2620_v3 }
 0xb4a   : > { %v2633_v10 = vmul.f32 %v2954_v9, %v2627_v41 }
 0xb4c   : > { %v2639_v16 = vadd.f32 %v2955_v59, %v2633_v10 }
 0xb4e   : > { %2640 = vst [vmem:[%s327_s12] sm:$0xff] %v2639_v16 }
 0xb4f PF: > { %s19_s30 = sadd.s32 1, %s3455_s30  }
 0xb50   : > { %p16_p4 = scmp.ge.s32.totalorder %s19_s30, 4  }
 0xb52   :  { %18 = sbr.rel (!%p16_p4) target bundleno = 1 (0x1), region = 88 }

</bundles_post_ra>
